<compile_context>
chip_gen: v7x
topology: tpu7x:2x2x1
jax: 0.10.0
libtpu: 0.0.40
codegen_flags: <defaults>
</compile_context>

<pallas_src>
import jax
import jax.numpy as jnp
from jax import lax
from jax.experimental import pallas as pl
from jax.experimental.pallas import tpu as pltpu


# ----------------------------------------------------------------------------
# Pallas kernel: one invocation runs the full recurrence + final FC + sigmoid.
# Inputs (whole arrays, VMEM-resident):
#   x_ref    : (T*B, E)   time-major flattened embedded tokens
#   wih_ref  : (E, 4H)    W_ih^T
#   whh_ref  : (H, 4H)    W_hh^T
#   b_ref    : (1, 4H)    b_ih + b_hh
#   wfc_ref  : (H, 128)   W_fc^T zero-padded to 128 output lanes
#   bfc_ref  : (1, 128)   b_fc zero-padded
# Output:
#   out_ref  : (B, 128)   sigmoid(fc(h_T)) in lanes [:C], junk elsewhere
# Scratch:
#   xproj_ref: (T, B, 4H) hoisted input projection
# ----------------------------------------------------------------------------
def lstm_fc_kernel(x_ref, wih_ref, whh_ref, b_ref, wfc_ref, bfc_ref,
                   out_ref, xproj_ref):
    T, B, G = xproj_ref.shape
    H = G // 4

    # --- Hoisted input projection: one batched MXU op, off the serial chain.
    x_proj = (jnp.dot(x_ref[...], wih_ref[...],
                      preferred_element_type=jnp.float32)
              + b_ref[...])                       # (T*B, 4H)
    xproj_ref[...] = x_proj.reshape(T, B, G)

    whh = whh_ref[...]                            # keep resident across steps

    # --- Recurrence: one matmul + lane-aligned gate math per step.
    def step(t, carry):
        h, c = carry
        gates = xproj_ref[t] + jnp.dot(h, whh,
                                       preferred_element_type=jnp.float32)
        i_g = jax.nn.sigmoid(gates[:, 0 * H:1 * H])
        f_g = jax.nn.sigmoid(gates[:, 1 * H:2 * H])
        g_g = jnp.tanh(gates[:, 2 * H:3 * H])
        o_g = jax.nn.sigmoid(gates[:, 3 * H:4 * H])
        c_new = f_g * c + i_g * g_g
        h_new = o_g * jnp.tanh(c_new)
        return (h_new, c_new)

    h0 = jnp.zeros((B, H), jnp.float32)
    c0 = jnp.zeros((B, H), jnp.float32)
    h_last, _ = lax.fori_loop(0, T, step, (h0, c0), unroll=True)

    # Dropout(0.5) is identity in eval mode.
    # TODO(synk): training-mode dropout would need an in-kernel PRNG mask.
    logits = (jnp.dot(h_last, wfc_ref[...],
                      preferred_element_type=jnp.float32)
              + bfc_ref[...])                     # (B, 128) lane-dense
    out_ref[...] = jax.nn.sigmoid(logits)


def lstm_model_pallas(tokens, params):
    """tokens: (B, T) int32; returns (B, 1) float32 = sigmoid(fc(h_T))."""
    emb = params["embedding"]           # (V, E)
    wih = params["w_ih"]                # (E, 4H)
    whh = params["w_hh"]                # (H, 4H)
    b = params["b"]                     # (1, 4H)
    wfc = params["w_fc"]                # (H, 1)
    bfc = params["b_fc"]                # (1, 1)

    B, T = tokens.shape
    E = emb.shape[1]
    H = whh.shape[0]
    C = wfc.shape[1]
    C_PAD = 128                         # lane-dense output slab

    # Zero-pad FC to 128 output lanes (unmasked stores in-kernel).
    wfc_p = jnp.zeros((H, C_PAD), jnp.float32).at[:, :C].set(wfc)
    bfc_p = jnp.zeros((1, C_PAD), jnp.float32).at[:, :C].set(bfc)

    # Glue: embedding gather + time-major flatten (T*B, E).
    x = jnp.take(emb, tokens, axis=0)                              # (B, T, E)
    x_flat = jnp.transpose(x, (1, 0, 2)).reshape(T * B, E)         # (T*B, E)
    x_flat = x_flat.astype(jnp.float32)

    vmem = lambda: pl.BlockSpec(memory_space=pltpu.MemorySpace.VMEM)
    out_padded = pl.pallas_call(
        lstm_fc_kernel,
        out_shape=jax.ShapeDtypeStruct((B, C_PAD), jnp.float32),
        in_specs=[vmem() for _ in range(6)],
        out_specs=vmem(),
        scratch_shapes=[pltpu.VMEM((T, B, 4 * H), jnp.float32)],
    )(x_flat, wih, whh, b, wfc_p, bfc_p)

    return out_padded[:, :C]


# ----------------------------------------------------------------------------
# Pure-JAX reference (mirrors torch semantics) for correctness check.
# ----------------------------------------------------------------------------
def lstm_model_ref(tokens, params):
    emb = params["embedding"]
    wih, whh, b = params["w_ih"], params["w_hh"], params["b"]
    wfc, bfc = params["w_fc"], params["b_fc"]
    H = whh.shape[0]

    x = jnp.take(emb, tokens, axis=0).astype(jnp.float32)     # (B, T, E)
    B = x.shape[0]

    def step(carry, x_t):
        h, c = carry
        gates = x_t @ wih + h @ whh + b[0]
        i = jax.nn.sigmoid(gates[:, :H])
        f = jax.nn.sigmoid(gates[:, H:2 * H])
        g = jnp.tanh(gates[:, 2 * H:3 * H])
        o = jax.nn.sigmoid(gates[:, 3 * H:])
        c = f * c + i * g
        h = o * jnp.tanh(c)
        return (h, c), None

    h0 = jnp.zeros((B, H), jnp.float32)
    c0 = jnp.zeros((B, H), jnp.float32)
    (h_last, _), _ = lax.scan(step, (h0, c0), jnp.transpose(x, (1, 0, 2)))
    return jax.nn.sigmoid(h_last @ wfc + bfc[0])


# ----------------------------------------------------------------------------
# Deterministic parameter initialization (shapes from LSTMModel.__init__).
# ----------------------------------------------------------------------------
def init_params(key, max_index, embedding_dim, hidden_size):
    ks = jax.random.split(key, 8)
    scale = 0.1
    emb = scale * jax.random.normal(ks[0], (max_index, embedding_dim), jnp.float32)
    emb = emb.at[0].set(0.0)                         # padding_idx=0 -> zero row

    # PyTorch stores (4H, E)/(4H, H); we store transposed for x @ W (gate order i,f,g,o).
    w_ih = scale * jax.random.normal(ks[1], (embedding_dim, 4 * hidden_size), jnp.float32)
    w_hh = scale * jax.random.normal(ks[2], (hidden_size, 4 * hidden_size), jnp.float32)
    b_ih = scale * jax.random.normal(ks[3], (4 * hidden_size,), jnp.float32)
    b_hh = scale * jax.random.normal(ks[4], (4 * hidden_size,), jnp.float32)
    b = (b_ih + b_hh).reshape(1, -1)

    w_fc = scale * jax.random.normal(ks[5], (hidden_size, 1), jnp.float32)
    b_fc = scale * jax.random.normal(ks[6], (1,), jnp.float32).reshape(1, 1)

    return {"embedding": emb, "w_ih": w_ih, "w_hh": w_hh, "b": b,
            "w_fc": w_fc, "b_fc": b_fc}


if __name__ == "__main__":
    MAX_INDEX = 64
    EMB_DIM = 32
    HIDDEN = 128       # lane-aligned hidden size (gates = 4 full 128-lane groups)
    BATCH = 8
    SEQ = 8

    key = jax.random.PRNGKey(0)
    k_param, k_tok = jax.random.split(key)
    params = init_params(k_param, MAX_INDEX, EMB_DIM, HIDDEN)

    tokens = jax.random.randint(k_tok, (BATCH, SEQ), 0, MAX_INDEX, dtype=jnp.int32)

    out = lstm_model_pallas(tokens, params)
    out = jax.block_until_ready(out)

    ref = jax.block_until_ready(lstm_model_ref(tokens, params))
    assert out.shape == (BATCH, 1), out.shape
    assert jnp.allclose(out, ref, atol=1e-5, rtol=1e-5), (out, ref)

    print("KERNEL_OK")
</pallas_src>

<mosaic_0001>
module attributes {stable_mosaic.version = 11 : i64} {
  func.func @lstm_fc_kernel(%arg0: memref<64x32xf32, #tpu.memory_space<vmem>>, %arg1: memref<32x512xf32, #tpu.memory_space<vmem>>, %arg2: memref<128x512xf32, #tpu.memory_space<vmem>>, %arg3: memref<1x512xf32, #tpu.memory_space<vmem>>, %arg4: memref<128x128xf32, #tpu.memory_space<vmem>>, %arg5: memref<1x128xf32, #tpu.memory_space<vmem>>, %arg6: memref<8x128xf32, #tpu.memory_space<vmem>>, %arg7: memref<8x8x512xf32, #tpu.memory_space<vmem>>) attributes {dimension_semantics = [], scalar_prefetch = 0 : i64, scratch_operands = 1 : i64, tpu.core_type = #tpu.core_type<tc>} {
    %c0 = arith.constant 0 : index
    %c0_0 = arith.constant 0 : index
    %0 = vector.load %arg0[%c0, %c0_0] : memref<64x32xf32, #tpu.memory_space<vmem>>, vector<64x32xf32>
    %c0_1 = arith.constant 0 : index
    %c0_2 = arith.constant 0 : index
    %1 = vector.load %arg1[%c0_1, %c0_2] : memref<32x512xf32, #tpu.memory_space<vmem>>, vector<32x512xf32>
    %cst = arith.constant dense<0.000000e+00> : vector<64x512xf32>
    %2 = tpu.matmul %0, %1, %cst {dimension_numbers = #tpu.dot_dimension_numbers<[1], [0], [0], [1], [0, 0, 1, 1], [], []>} : vector<64x32xf32>, vector<32x512xf32>, vector<64x512xf32> -> vector<64x512xf32>
    %c0_3 = arith.constant 0 : index
    %c0_4 = arith.constant 0 : index
    %3 = vector.load %arg3[%c0_3, %c0_4] : memref<1x512xf32, #tpu.memory_space<vmem>>, vector<1x512xf32>
    %4 = vector.broadcast %3 : vector<1x512xf32> to vector<64x512xf32>
    %5 = arith.addf %2, %4 : vector<64x512xf32>
    %6 = vector.shape_cast %5 : vector<64x512xf32> to vector<8x8x512xf32>
    %c0_5 = arith.constant 0 : index
    %c0_6 = arith.constant 0 : index
    %c0_7 = arith.constant 0 : index
    %7 = vector.load %arg7[%c0_5, %c0_6, %c0_7] : memref<8x8x512xf32, #tpu.memory_space<vmem>>, vector<8x8x512xf32>
    tpu.vector_store %arg7[%c0_5, %c0_6, %c0_7], %6 {strides = array<i32>} : memref<8x8x512xf32, #tpu.memory_space<vmem>>, vector<8x8x512xf32>,
    %c0_8 = arith.constant 0 : index
    %c0_9 = arith.constant 0 : index
    %8 = vector.load %arg2[%c0_8, %c0_9] : memref<128x512xf32, #tpu.memory_space<vmem>>, vector<128x512xf32>
    %cst_10 = arith.constant 0.000000e+00 : f32
    %9 = vector.broadcast %cst_10 : f32 to vector<8x128xf32>
    %cst_11 = arith.constant 0.000000e+00 : f32
    %10 = vector.broadcast %cst_11 : f32 to vector<8x128xf32>
    %c0_i32 = arith.constant 0 : i32
    %11 = arith.index_cast %c0_i32 : i32 to index
    %c0_12 = arith.constant 0 : index
    %c0_13 = arith.constant 0 : index
    %12 = vector.load %arg7[%11, %c0_12, %c0_13] : memref<8x8x512xf32, #tpu.memory_space<vmem>>, vector<1x8x512xf32>
    %13 = vector.shape_cast %12 : vector<1x8x512xf32> to vector<8x512xf32>
    %cst_14 = arith.constant dense<0.000000e+00> : vector<8x512xf32>
    %14 = tpu.matmul %9, %8, %cst_14 {dimension_numbers = #tpu.dot_dimension_numbers<[1], [0], [0], [1], [0, 0, 1, 1], [], []>} : vector<8x128xf32>, vector<128x512xf32>, vector<8x512xf32> -> vector<8x512xf32>
    %15 = arith.addf %13, %14 : vector<8x512xf32>
    %16 = vector.extract_strided_slice %15 {offsets = [0, 0], sizes = [8, 128], strides = [1, 1]} : vector<8x512xf32> to vector<8x128xf32>
    %17 = arith.negf %16 : vector<8x128xf32>
    %18 = math.exp %17 : vector<8x128xf32>
    %cst_15 = arith.constant 1.000000e+00 : f32
    %19 = vector.broadcast %cst_15 : f32 to vector<8x128xf32>
    %20 = arith.addf %19, %18 : vector<8x128xf32>
    %21 = arith.divf %19, %20 : vector<8x128xf32>
    %22 = vector.extract_strided_slice %15 {offsets = [0, 128], sizes = [8, 128], strides = [1, 1]} : vector<8x512xf32> to vector<8x128xf32>
    %23 = arith.negf %22 : vector<8x128xf32>
    %24 = math.exp %23 : vector<8x128xf32>
    %cst_16 = arith.constant 1.000000e+00 : f32
    %25 = vector.broadcast %cst_16 : f32 to vector<8x128xf32>
    %26 = arith.addf %25, %24 : vector<8x128xf32>
    %27 = arith.divf %25, %26 : vector<8x128xf32>
    %28 = vector.extract_strided_slice %15 {offsets = [0, 256], sizes = [8, 128], strides = [1, 1]} : vector<8x512xf32> to vector<8x128xf32>
    %29 = math.tanh %28 : vector<8x128xf32>
    %30 = vector.extract_strided_slice %15 {offsets = [0, 384], sizes = [8, 128], strides = [1, 1]} : vector<8x512xf32> to vector<8x128xf32>
    %31 = arith.negf %30 : vector<8x128xf32>
    %32 = math.exp %31 : vector<8x128xf32>
    %cst_17 = arith.constant 1.000000e+00 : f32
    %33 = vector.broadcast %cst_17 : f32 to vector<8x128xf32>
    %34 = arith.addf %33, %32 : vector<8x128xf32>
    %35 = arith.divf %33, %34 : vector<8x128xf32>
    %36 = arith.mulf %27, %10 : vector<8x128xf32>
    %37 = arith.mulf %21, %29 : vector<8x128xf32>
    %38 = arith.addf %36, %37 : vector<8x128xf32>
    %39 = math.tanh %38 : vector<8x128xf32>
    %40 = arith.mulf %35, %39 : vector<8x128xf32>
    %c1_i32 = arith.constant 1 : i32
    %41 = arith.index_cast %c1_i32 : i32 to index
    %c0_18 = arith.constant 0 : index
    %c0_19 = arith.constant 0 : index
    %42 = vector.load %arg7[%41, %c0_18, %c0_19] : memref<8x8x512xf32, #tpu.memory_space<vmem>>, vector<1x8x512xf32>
    %43 = vector.shape_cast %42 : vector<1x8x512xf32> to vector<8x512xf32>
    %cst_20 = arith.constant dense<0.000000e+00> : vector<8x512xf32>
    %44 = tpu.matmul %40, %8, %cst_20 {dimension_numbers = #tpu.dot_dimension_numbers<[1], [0], [0], [1], [0, 0, 1, 1], [], []>} : vector<8x128xf32>, vector<128x512xf32>, vector<8x512xf32> -> vector<8x512xf32>
    %45 = arith.addf %43, %44 : vector<8x512xf32>
    %46 = vector.extract_strided_slice %45 {offsets = [0, 0], sizes = [8, 128], strides = [1, 1]} : vector<8x512xf32> to vector<8x128xf32>
    %47 = arith.negf %46 : vector<8x128xf32>
    %48 = math.exp %47 : vector<8x128xf32>
    %cst_21 = arith.constant 1.000000e+00 : f32
    %49 = vector.broadcast %cst_21 : f32 to vector<8x128xf32>
    %50 = arith.addf %49, %48 : vector<8x128xf32>
    %51 = arith.divf %49, %50 : vector<8x128xf32>
    %52 = vector.extract_strided_slice %45 {offsets = [0, 128], sizes = [8, 128], strides = [1, 1]} : vector<8x512xf32> to vector<8x128xf32>
    %53 = arith.negf %52 : vector<8x128xf32>
    %54 = math.exp %53 : vector<8x128xf32>
    %cst_22 = arith.constant 1.000000e+00 : f32
    %55 = vector.broadcast %cst_22 : f32 to vector<8x128xf32>
    %56 = arith.addf %55, %54 : vector<8x128xf32>
    %57 = arith.divf %55, %56 : vector<8x128xf32>
    %58 = vector.extract_strided_slice %45 {offsets = [0, 256], sizes = [8, 128], strides = [1, 1]} : vector<8x512xf32> to vector<8x128xf32>
    %59 = math.tanh %58 : vector<8x128xf32>
    %60 = vector.extract_strided_slice %45 {offsets = [0, 384], sizes = [8, 128], strides = [1, 1]} : vector<8x512xf32> to vector<8x128xf32>
    %61 = arith.negf %60 : vector<8x128xf32>
    %62 = math.exp %61 : vector<8x128xf32>
    %cst_23 = arith.constant 1.000000e+00 : f32
    %63 = vector.broadcast %cst_23 : f32 to vector<8x128xf32>
    %64 = arith.addf %63, %62 : vector<8x128xf32>
    %65 = arith.divf %63, %64 : vector<8x128xf32>
    %66 = arith.mulf %57, %38 : vector<8x128xf32>
    %67 = arith.mulf %51, %59 : vector<8x128xf32>
    %68 = arith.addf %66, %67 : vector<8x128xf32>
    %69 = math.tanh %68 : vector<8x128xf32>
    %70 = arith.mulf %65, %69 : vector<8x128xf32>
    %c2_i32 = arith.constant 2 : i32
    %71 = arith.index_cast %c2_i32 : i32 to index
    %c0_24 = arith.constant 0 : index
    %c0_25 = arith.constant 0 : index
    %72 = vector.load %arg7[%71, %c0_24, %c0_25] : memref<8x8x512xf32, #tpu.memory_space<vmem>>, vector<1x8x512xf32>
    %73 = vector.shape_cast %72 : vector<1x8x512xf32> to vector<8x512xf32>
    %cst_26 = arith.constant dense<0.000000e+00> : vector<8x512xf32>
    %74 = tpu.matmul %70, %8, %cst_26 {dimension_numbers = #tpu.dot_dimension_numbers<[1], [0], [0], [1], [0, 0, 1, 1], [], []>} : vector<8x128xf32>, vector<128x512xf32>, vector<8x512xf32> -> vector<8x512xf32>
    %75 = arith.addf %73, %74 : vector<8x512xf32>
    %76 = vector.extract_strided_slice %75 {offsets = [0, 0], sizes = [8, 128], strides = [1, 1]} : vector<8x512xf32> to vector<8x128xf32>
    %77 = arith.negf %76 : vector<8x128xf32>
    %78 = math.exp %77 : vector<8x128xf32>
    %cst_27 = arith.constant 1.000000e+00 : f32
    %79 = vector.broadcast %cst_27 : f32 to vector<8x128xf32>
    %80 = arith.addf %79, %78 : vector<8x128xf32>
    %81 = arith.divf %79, %80 : vector<8x128xf32>
    %82 = vector.extract_strided_slice %75 {offsets = [0, 128], sizes = [8, 128], strides = [1, 1]} : vector<8x512xf32> to vector<8x128xf32>
    %83 = arith.negf %82 : vector<8x128xf32>
    %84 = math.exp %83 : vector<8x128xf32>
    %cst_28 = arith.constant 1.000000e+00 : f32
    %85 = vector.broadcast %cst_28 : f32 to vector<8x128xf32>
    %86 = arith.addf %85, %84 : vector<8x128xf32>
    %87 = arith.divf %85, %86 : vector<8x128xf32>
    %88 = vector.extract_strided_slice %75 {offsets = [0, 256], sizes = [8, 128], strides = [1, 1]} : vector<8x512xf32> to vector<8x128xf32>
    %89 = math.tanh %88 : vector<8x128xf32>
    %90 = vector.extract_strided_slice %75 {offsets = [0, 384], sizes = [8, 128], strides = [1, 1]} : vector<8x512xf32> to vector<8x128xf32>
    %91 = arith.negf %90 : vector<8x128xf32>
    %92 = math.exp %91 : vector<8x128xf32>
    %cst_29 = arith.constant 1.000000e+00 : f32
    %93 = vector.broadcast %cst_29 : f32 to vector<8x128xf32>
    %94 = arith.addf %93, %92 : vector<8x128xf32>
    %95 = arith.divf %93, %94 : vector<8x128xf32>
    %96 = arith.mulf %87, %68 : vector<8x128xf32>
    %97 = arith.mulf %81, %89 : vector<8x128xf32>
    %98 = arith.addf %96, %97 : vector<8x128xf32>
    %99 = math.tanh %98 : vector<8x128xf32>
    %100 = arith.mulf %95, %99 : vector<8x128xf32>
    %c3_i32 = arith.constant 3 : i32
    %101 = arith.index_cast %c3_i32 : i32 to index
    %c0_30 = arith.constant 0 : index
    %c0_31 = arith.constant 0 : index
    %102 = vector.load %arg7[%101, %c0_30, %c0_31] : memref<8x8x512xf32, #tpu.memory_space<vmem>>, vector<1x8x512xf32>
    %103 = vector.shape_cast %102 : vector<1x8x512xf32> to vector<8x512xf32>
    %cst_32 = arith.constant dense<0.000000e+00> : vector<8x512xf32>
    %104 = tpu.matmul %100, %8, %cst_32 {dimension_numbers = #tpu.dot_dimension_numbers<[1], [0], [0], [1], [0, 0, 1, 1], [], []>} : vector<8x128xf32>, vector<128x512xf32>, vector<8x512xf32> -> vector<8x512xf32>
    %105 = arith.addf %103, %104 : vector<8x512xf32>
    %106 = vector.extract_strided_slice %105 {offsets = [0, 0], sizes = [8, 128], strides = [1, 1]} : vector<8x512xf32> to vector<8x128xf32>
    %107 = arith.negf %106 : vector<8x128xf32>
    %108 = math.exp %107 : vector<8x128xf32>
    %cst_33 = arith.constant 1.000000e+00 : f32
    %109 = vector.broadcast %cst_33 : f32 to vector<8x128xf32>
    %110 = arith.addf %109, %108 : vector<8x128xf32>
    %111 = arith.divf %109, %110 : vector<8x128xf32>
    %112 = vector.extract_strided_slice %105 {offsets = [0, 128], sizes = [8, 128], strides = [1, 1]} : vector<8x512xf32> to vector<8x128xf32>
    %113 = arith.negf %112 : vector<8x128xf32>
    %114 = math.exp %113 : vector<8x128xf32>
    %cst_34 = arith.constant 1.000000e+00 : f32
    %115 = vector.broadcast %cst_34 : f32 to vector<8x128xf32>
    %116 = arith.addf %115, %114 : vector<8x128xf32>
    %117 = arith.divf %115, %116 : vector<8x128xf32>
    %118 = vector.extract_strided_slice %105 {offsets = [0, 256], sizes = [8, 128], strides = [1, 1]} : vector<8x512xf32> to vector<8x128xf32>
    %119 = math.tanh %118 : vector<8x128xf32>
    %120 = vector.extract_strided_slice %105 {offsets = [0, 384], sizes = [8, 128], strides = [1, 1]} : vector<8x512xf32> to vector<8x128xf32>
    %121 = arith.negf %120 : vector<8x128xf32>
    %122 = math.exp %121 : vector<8x128xf32>
    %cst_35 = arith.constant 1.000000e+00 : f32
    %123 = vector.broadcast %cst_35 : f32 to vector<8x128xf32>
    %124 = arith.addf %123, %122 : vector<8x128xf32>
    %125 = arith.divf %123, %124 : vector<8x128xf32>
    %126 = arith.mulf %117, %98 : vector<8x128xf32>
    %127 = arith.mulf %111, %119 : vector<8x128xf32>
    %128 = arith.addf %126, %127 : vector<8x128xf32>
    %129 = math.tanh %128 : vector<8x128xf32>
    %130 = arith.mulf %125, %129 : vector<8x128xf32>
    %c4_i32 = arith.constant 4 : i32
    %131 = arith.index_cast %c4_i32 : i32 to index
    %c0_36 = arith.constant 0 : index
    %c0_37 = arith.constant 0 : index
    %132 = vector.load %arg7[%131, %c0_36, %c0_37] : memref<8x8x512xf32, #tpu.memory_space<vmem>>, vector<1x8x512xf32>
    %133 = vector.shape_cast %132 : vector<1x8x512xf32> to vector<8x512xf32>
    %cst_38 = arith.constant dense<0.000000e+00> : vector<8x512xf32>
    %134 = tpu.matmul %130, %8, %cst_38 {dimension_numbers = #tpu.dot_dimension_numbers<[1], [0], [0], [1], [0, 0, 1, 1], [], []>} : vector<8x128xf32>, vector<128x512xf32>, vector<8x512xf32> -> vector<8x512xf32>
    %135 = arith.addf %133, %134 : vector<8x512xf32>
    %136 = vector.extract_strided_slice %135 {offsets = [0, 0], sizes = [8, 128], strides = [1, 1]} : vector<8x512xf32> to vector<8x128xf32>
    %137 = arith.negf %136 : vector<8x128xf32>
    %138 = math.exp %137 : vector<8x128xf32>
    %cst_39 = arith.constant 1.000000e+00 : f32
    %139 = vector.broadcast %cst_39 : f32 to vector<8x128xf32>
    %140 = arith.addf %139, %138 : vector<8x128xf32>
    %141 = arith.divf %139, %140 : vector<8x128xf32>
    %142 = vector.extract_strided_slice %135 {offsets = [0, 128], sizes = [8, 128], strides = [1, 1]} : vector<8x512xf32> to vector<8x128xf32>
    %143 = arith.negf %142 : vector<8x128xf32>
    %144 = math.exp %143 : vector<8x128xf32>
    %cst_40 = arith.constant 1.000000e+00 : f32
    %145 = vector.broadcast %cst_40 : f32 to vector<8x128xf32>
    %146 = arith.addf %145, %144 : vector<8x128xf32>
    %147 = arith.divf %145, %146 : vector<8x128xf32>
    %148 = vector.extract_strided_slice %135 {offsets = [0, 256], sizes = [8, 128], strides = [1, 1]} : vector<8x512xf32> to vector<8x128xf32>
    %149 = math.tanh %148 : vector<8x128xf32>
    %150 = vector.extract_strided_slice %135 {offsets = [0, 384], sizes = [8, 128], strides = [1, 1]} : vector<8x512xf32> to vector<8x128xf32>
    %151 = arith.negf %150 : vector<8x128xf32>
    %152 = math.exp %151 : vector<8x128xf32>
    %cst_41 = arith.constant 1.000000e+00 : f32
    %153 = vector.broadcast %cst_41 : f32 to vector<8x128xf32>
    %154 = arith.addf %153, %152 : vector<8x128xf32>
    %155 = arith.divf %153, %154 : vector<8x128xf32>
    %156 = arith.mulf %147, %128 : vector<8x128xf32>
    %157 = arith.mulf %141, %149 : vector<8x128xf32>
    %158 = arith.addf %156, %157 : vector<8x128xf32>
    %159 = math.tanh %158 : vector<8x128xf32>
    %160 = arith.mulf %155, %159 : vector<8x128xf32>
    %c5_i32 = arith.constant 5 : i32
    %161 = arith.index_cast %c5_i32 : i32 to index
    %c0_42 = arith.constant 0 : index
    %c0_43 = arith.constant 0 : index
    %162 = vector.load %arg7[%161, %c0_42, %c0_43] : memref<8x8x512xf32, #tpu.memory_space<vmem>>, vector<1x8x512xf32>
    %163 = vector.shape_cast %162 : vector<1x8x512xf32> to vector<8x512xf32>
    %cst_44 = arith.constant dense<0.000000e+00> : vector<8x512xf32>
    %164 = tpu.matmul %160, %8, %cst_44 {dimension_numbers = #tpu.dot_dimension_numbers<[1], [0], [0], [1], [0, 0, 1, 1], [], []>} : vector<8x128xf32>, vector<128x512xf32>, vector<8x512xf32> -> vector<8x512xf32>
    %165 = arith.addf %163, %164 : vector<8x512xf32>
    %166 = vector.extract_strided_slice %165 {offsets = [0, 0], sizes = [8, 128], strides = [1, 1]} : vector<8x512xf32> to vector<8x128xf32>
    %167 = arith.negf %166 : vector<8x128xf32>
    %168 = math.exp %167 : vector<8x128xf32>
    %cst_45 = arith.constant 1.000000e+00 : f32
    %169 = vector.broadcast %cst_45 : f32 to vector<8x128xf32>
    %170 = arith.addf %169, %168 : vector<8x128xf32>
    %171 = arith.divf %169, %170 : vector<8x128xf32>
    %172 = vector.extract_strided_slice %165 {offsets = [0, 128], sizes = [8, 128], strides = [1, 1]} : vector<8x512xf32> to vector<8x128xf32>
    %173 = arith.negf %172 : vector<8x128xf32>
    %174 = math.exp %173 : vector<8x128xf32>
    %cst_46 = arith.constant 1.000000e+00 : f32
    %175 = vector.broadcast %cst_46 : f32 to vector<8x128xf32>
    %176 = arith.addf %175, %174 : vector<8x128xf32>
    %177 = arith.divf %175, %176 : vector<8x128xf32>
    %178 = vector.extract_strided_slice %165 {offsets = [0, 256], sizes = [8, 128], strides = [1, 1]} : vector<8x512xf32> to vector<8x128xf32>
    %179 = math.tanh %178 : vector<8x128xf32>
    %180 = vector.extract_strided_slice %165 {offsets = [0, 384], sizes = [8, 128], strides = [1, 1]} : vector<8x512xf32> to vector<8x128xf32>
    %181 = arith.negf %180 : vector<8x128xf32>
    %182 = math.exp %181 : vector<8x128xf32>
    %cst_47 = arith.constant 1.000000e+00 : f32
    %183 = vector.broadcast %cst_47 : f32 to vector<8x128xf32>
    %184 = arith.addf %183, %182 : vector<8x128xf32>
    %185 = arith.divf %183, %184 : vector<8x128xf32>
    %186 = arith.mulf %177, %158 : vector<8x128xf32>
    %187 = arith.mulf %171, %179 : vector<8x128xf32>
    %188 = arith.addf %186, %187 : vector<8x128xf32>
    %189 = math.tanh %188 : vector<8x128xf32>
    %190 = arith.mulf %185, %189 : vector<8x128xf32>
    %c6_i32 = arith.constant 6 : i32
    %191 = arith.index_cast %c6_i32 : i32 to index
    %c0_48 = arith.constant 0 : index
    %c0_49 = arith.constant 0 : index
    %192 = vector.load %arg7[%191, %c0_48, %c0_49] : memref<8x8x512xf32, #tpu.memory_space<vmem>>, vector<1x8x512xf32>
    %193 = vector.shape_cast %192 : vector<1x8x512xf32> to vector<8x512xf32>
    %cst_50 = arith.constant dense<0.000000e+00> : vector<8x512xf32>
    %194 = tpu.matmul %190, %8, %cst_50 {dimension_numbers = #tpu.dot_dimension_numbers<[1], [0], [0], [1], [0, 0, 1, 1], [], []>} : vector<8x128xf32>, vector<128x512xf32>, vector<8x512xf32> -> vector<8x512xf32>
    %195 = arith.addf %193, %194 : vector<8x512xf32>
    %196 = vector.extract_strided_slice %195 {offsets = [0, 0], sizes = [8, 128], strides = [1, 1]} : vector<8x512xf32> to vector<8x128xf32>
    %197 = arith.negf %196 : vector<8x128xf32>
    %198 = math.exp %197 : vector<8x128xf32>
    %cst_51 = arith.constant 1.000000e+00 : f32
    %199 = vector.broadcast %cst_51 : f32 to vector<8x128xf32>
    %200 = arith.addf %199, %198 : vector<8x128xf32>
    %201 = arith.divf %199, %200 : vector<8x128xf32>
    %202 = vector.extract_strided_slice %195 {offsets = [0, 128], sizes = [8, 128], strides = [1, 1]} : vector<8x512xf32> to vector<8x128xf32>
    %203 = arith.negf %202 : vector<8x128xf32>
    %204 = math.exp %203 : vector<8x128xf32>
    %cst_52 = arith.constant 1.000000e+00 : f32
    %205 = vector.broadcast %cst_52 : f32 to vector<8x128xf32>
    %206 = arith.addf %205, %204 : vector<8x128xf32>
    %207 = arith.divf %205, %206 : vector<8x128xf32>
    %208 = vector.extract_strided_slice %195 {offsets = [0, 256], sizes = [8, 128], strides = [1, 1]} : vector<8x512xf32> to vector<8x128xf32>
    %209 = math.tanh %208 : vector<8x128xf32>
    %210 = vector.extract_strided_slice %195 {offsets = [0, 384], sizes = [8, 128], strides = [1, 1]} : vector<8x512xf32> to vector<8x128xf32>
    %211 = arith.negf %210 : vector<8x128xf32>
    %212 = math.exp %211 : vector<8x128xf32>
    %cst_53 = arith.constant 1.000000e+00 : f32
    %213 = vector.broadcast %cst_53 : f32 to vector<8x128xf32>
    %214 = arith.addf %213, %212 : vector<8x128xf32>
    %215 = arith.divf %213, %214 : vector<8x128xf32>
    %216 = arith.mulf %207, %188 : vector<8x128xf32>
    %217 = arith.mulf %201, %209 : vector<8x128xf32>
    %218 = arith.addf %216, %217 : vector<8x128xf32>
    %219 = math.tanh %218 : vector<8x128xf32>
    %220 = arith.mulf %215, %219 : vector<8x128xf32>
    %c7_i32 = arith.constant 7 : i32
    %221 = arith.index_cast %c7_i32 : i32 to index
    %c0_54 = arith.constant 0 : index
    %c0_55 = arith.constant 0 : index
    %222 = vector.load %arg7[%221, %c0_54, %c0_55] : memref<8x8x512xf32, #tpu.memory_space<vmem>>, vector<1x8x512xf32>
    %223 = vector.shape_cast %222 : vector<1x8x512xf32> to vector<8x512xf32>
    %cst_56 = arith.constant dense<0.000000e+00> : vector<8x512xf32>
    %224 = tpu.matmul %220, %8, %cst_56 {dimension_numbers = #tpu.dot_dimension_numbers<[1], [0], [0], [1], [0, 0, 1, 1], [], []>} : vector<8x128xf32>, vector<128x512xf32>, vector<8x512xf32> -> vector<8x512xf32>
    %225 = arith.addf %223, %224 : vector<8x512xf32>
    %226 = vector.extract_strided_slice %225 {offsets = [0, 0], sizes = [8, 128], strides = [1, 1]} : vector<8x512xf32> to vector<8x128xf32>
    %227 = arith.negf %226 : vector<8x128xf32>
    %228 = math.exp %227 : vector<8x128xf32>
    %cst_57 = arith.constant 1.000000e+00 : f32
    %229 = vector.broadcast %cst_57 : f32 to vector<8x128xf32>
    %230 = arith.addf %229, %228 : vector<8x128xf32>
    %231 = arith.divf %229, %230 : vector<8x128xf32>
    %232 = vector.extract_strided_slice %225 {offsets = [0, 128], sizes = [8, 128], strides = [1, 1]} : vector<8x512xf32> to vector<8x128xf32>
    %233 = arith.negf %232 : vector<8x128xf32>
    %234 = math.exp %233 : vector<8x128xf32>
    %cst_58 = arith.constant 1.000000e+00 : f32
    %235 = vector.broadcast %cst_58 : f32 to vector<8x128xf32>
    %236 = arith.addf %235, %234 : vector<8x128xf32>
    %237 = arith.divf %235, %236 : vector<8x128xf32>
    %238 = vector.extract_strided_slice %225 {offsets = [0, 256], sizes = [8, 128], strides = [1, 1]} : vector<8x512xf32> to vector<8x128xf32>
    %239 = math.tanh %238 : vector<8x128xf32>
    %240 = vector.extract_strided_slice %225 {offsets = [0, 384], sizes = [8, 128], strides = [1, 1]} : vector<8x512xf32> to vector<8x128xf32>
    %241 = arith.negf %240 : vector<8x128xf32>
    %242 = math.exp %241 : vector<8x128xf32>
    %cst_59 = arith.constant 1.000000e+00 : f32
    %243 = vector.broadcast %cst_59 : f32 to vector<8x128xf32>
    %244 = arith.addf %243, %242 : vector<8x128xf32>
    %245 = arith.divf %243, %244 : vector<8x128xf32>
    %246 = arith.mulf %237, %218 : vector<8x128xf32>
    %247 = arith.mulf %231, %239 : vector<8x128xf32>
    %248 = arith.addf %246, %247 : vector<8x128xf32>
    %249 = math.tanh %248 : vector<8x128xf32>
    %250 = arith.mulf %245, %249 : vector<8x128xf32>
    %c8_i32 = arith.constant 8 : i32
    %c0_60 = arith.constant 0 : index
    %c0_61 = arith.constant 0 : index
    %251 = vector.load %arg4[%c0_60, %c0_61] : memref<128x128xf32, #tpu.memory_space<vmem>>, vector<128x128xf32>
    %cst_62 = arith.constant dense<0.000000e+00> : vector<8x128xf32>
    %252 = tpu.matmul %250, %251, %cst_62 {dimension_numbers = #tpu.dot_dimension_numbers<[1], [0], [0], [1], [0, 0, 1, 1], [], []>} : vector<8x128xf32>, vector<128x128xf32>, vector<8x128xf32> -> vector<8x128xf32>
    %c0_63 = arith.constant 0 : index
    %c0_64 = arith.constant 0 : index
    %253 = vector.load %arg5[%c0_63, %c0_64] : memref<1x128xf32, #tpu.memory_space<vmem>>, vector<1x128xf32>
    %254 = vector.broadcast %253 : vector<1x128xf32> to vector<8x128xf32>
    %255 = arith.addf %252, %254 : vector<8x128xf32>
    %256 = arith.negf %255 : vector<8x128xf32>
    %257 = math.exp %256 : vector<8x128xf32>
    %cst_65 = arith.constant 1.000000e+00 : f32
    %258 = vector.broadcast %cst_65 : f32 to vector<8x128xf32>
    %259 = arith.addf %258, %257 : vector<8x128xf32>
    %260 = arith.divf %258, %259 : vector<8x128xf32>
    %c0_66 = arith.constant 0 : index
    %c0_67 = arith.constant 0 : index
    %261 = vector.load %arg6[%c0_66, %c0_67] : memref<8x128xf32, #tpu.memory_space<vmem>>, vector<8x128xf32>
    tpu.vector_store %arg6[%c0_66, %c0_67], %260 {strides = array<i32>} : memref<8x128xf32, #tpu.memory_space<vmem>>, vector<8x128xf32>,
    return
  }
}

</mosaic_0001>

<bundles_post_ra>
// kernel: tpu_custom_call.1
= control target key start
LH: loop header
LB: loop body
LE: loop exit
PB: predicated region body
PF: predicated region fallthrough
CT: control target
= control target key end

     0   :  { %11 = vsyncpa [#allocation4], 0  ;;  %s3490_s0 = inlined_call_operand.vmem [shape: f32[64,32], index: 0, kind: input, shape index: {}]   ;;  %s3491_s1 = inlined_call_operand.hbm [shape: f32[32,512], index: 1, kind: input, shape index: {}]   ;;  %s3492_s2 = inlined_call_operand.hbm [shape: f32[128,512], index: 2, kind: input, shape index: {}]   ;;  %s3493_s3 = inlined_call_operand.vmem [shape: f32[1,512], index: 3, kind: input, shape index: {}]   ;;  %s3494_s4 = inlined_call_operand.hbm [shape: f32[128,128], index: 4, kind: input, shape index: {}]   ;;  %s3495_s5 = inlined_call_operand.vmem [shape: f32[1,128], index: 5, kind: input, shape index: {}]   ;;  %s3496_s6 = inlined_call_operand.hbm [shape: f32[8,128], index: 6, kind: output, shape index: {}]  }
   0x1   :  { %12 = vsyncpa [#allocation7], 0 }
   0x2   :  { %13 = vsyncpa [#allocation5], 0  ;;  %s2920_s21 = smov [#allocation6]   ;;  %s2921_s23 = smov [#allocation3]  }
   0x3   :  { %s33_s22 = sshll.u32 %s2920_s21, 4  ;;  %s21_s24 = sshll.u32 %s2921_s23, 4  ;;  %s34_s22 = int_to_ptr.vmem [resolvable:$true] %s33_s22  ;;  %s2966_s24 = int_to_ptr.vmem [resolvable:$true] %s21_s24 }
   0x4   :  { %s2826_s27 = scalar_lea.hbm %s3492_s2, 8192 }
   0x5   :  { %p2827_p0 = scmp.ne.s32.totalorder %s3492_s2, %s2826_s27  ;;  %p2830_p1 = scmp.lt.u32.totalorder %s2826_s27, %s3492_s2 }
   0x7   :  { %p2832_p2 = pnand %p2830_p1, %p2827_p0 }
   0x9   :  { %2835 = shalt.err (!%p2832_p2)
}
   0xa   :  { %s2836_s8 = scalar_lea.vmem %s34_s22, 8192  ;;  %p2841_p4 = scmp.lt.s32.totalorder %s34_s22, %s34_s22 }
   0xb   :  { %p2837_p3 = scmp.ne.s32.totalorder %s34_s22, %s2836_s8  ;;  %p2842_p5 = scmp.lt.s32.totalorder %s2836_s8, %s2836_s8 }
   0xd   :  { %p2843_p6 = por %p2842_p5, %p2841_p4 }
   0xf   :  { %p2844_p7 = pnand %p2843_p6, %p2837_p3 }
  0x11   :  { %2847 = shalt.err (!%p2844_p7)
}
  0x12   :  { %s2922_s9 = smov 512   ;;  %s2923_s10 = smov 32  }
  0x13   :  { %39 = dma.hbm_to_vmem [thread:$0]  %s3492_s2, 8192, %s34_s22, [#allocation7], %s2922_s9, %s2922_s9, %s2923_s10  }
  0x14   :  { %s2848_s15 = scalar_lea.hbm %s3491_s1, 2048 }
  0x15   :  { %p2849_p8 = scmp.ne.s32.totalorder %s3491_s1, %s2848_s15  ;;  %p2852_p9 = scmp.lt.u32.totalorder %s2848_s15, %s3491_s1 }
  0x17   :  { %p2854_p10 = pnand %p2852_p9, %p2849_p8 }
  0x19   :  { %2857 = shalt.err (!%p2854_p10)
}
  0x1a   :  { %s2858_s20 = scalar_lea.vmem %s2966_s24, 2048  ;;  %p2863_p12 = scmp.lt.s32.totalorder %s2966_s24, %s2966_s24 }
  0x1b   :  { %p2859_p11 = scmp.ne.s32.totalorder %s2966_s24, %s2858_s20  ;;  %p2864_p13 = scmp.lt.s32.totalorder %s2858_s20, %s2858_s20 }
  0x1d   :  { %p2865_p0 = por %p2864_p13, %p2863_p12 }
  0x1f   :  { %p2866_p1 = pnand %p2865_p0, %p2859_p11 }
  0x21   :  { %2869 = shalt.err (!%p2866_p1)
}
  0x22   :  { %27 = dma.hbm_to_vmem [thread:$0]  %s3491_s1, 2048, %s2966_s24, [#allocation4], %s2922_s9, %s2922_s9, %s2923_s10  }
  0x23   :  { %s2924_s22 = smov [#allocation8]   ;;  %s2870_s27 = scalar_lea.hbm %s3494_s4, 2048 }
  0x24   :  { %s47_s23 = sshll.u32 %s2924_s22, 4  ;;  %p2871_p2 = scmp.ne.s32.totalorder %s3494_s4, %s2870_s27  ;;  %s48_s23 = int_to_ptr.vmem [resolvable:$true] %s47_s23 }
  0x25   :  { %p2874_p3 = scmp.lt.u32.totalorder %s2870_s27, %s3494_s4 }
  0x27   :  { %p2876_p4 = pnand %p2874_p3, %p2871_p2 }
  0x29   :  { %2879 = shalt.err (!%p2876_p4)
}
  0x2a   :  { %s2880_s8 = scalar_lea.vmem %s48_s23, 2048  ;;  %p2885_p6 = scmp.lt.s32.totalorder %s48_s23, %s48_s23 }
  0x2b   :  { %p2881_p5 = scmp.ne.s32.totalorder %s48_s23, %s2880_s8  ;;  %p2886_p7 = scmp.lt.s32.totalorder %s2880_s8, %s2880_s8 }
  0x2d   :  { %p2887_p8 = por %p2886_p7, %p2885_p6 }
  0x2f   :  { %p2888_p9 = pnand %p2887_p8, %p2881_p5 }
  0x31   :  { %2891 = shalt.err (!%p2888_p9)
}
  0x32   :  { %s2925_s1 = smov 128   ;;  %s2926_s24 = smov 8  }
  0x33   :  { %53 = dma.hbm_to_vmem [thread:$0]  %s3494_s4, 2048, %s48_s23, [#allocation7], %s2925_s1, %s2925_s1, %s2926_s24  }
  0x34   :  { %2914 = dma.done.wait [#allocation4], 2048  }
  0x35   :  { %2915 = vsyncadd [#allocation4], 4294965248 }
  0x36   :  { %2916 = dma.done.wait [#allocation7], 10240  }
  0x37   :  { %2917 = vsyncadd [#allocation7], 4294957056  ;;  %v2927_v0 = vmov 0.0   ;;  %v74_v1 = vld [vmem:[#allocation3 + $0x8] sm:$0xff]  ;;  %v76_v3 = vld [vmem:[#allocation3 + $0x18] sm:$0xff]  ;;  %vm111_vm0 = vcmask 261120  }
  0x38   :  { %200 = vmatprep.mubr.f32.mxu0 %v2927_v0  ;;  %313 = vmatprep.mubr.f32.mxu1 %v2927_v0  ;;  %v78_v2 = vld [vmem:[#allocation3 + $0x28] sm:$0xff]  ;;  %v80_v5 = vld [vmem:[#allocation3 + $0x38] sm:$0xff]  ;;  %v73_v6 = vld [vmem:[#allocation3] sm:$0xff]  ;;  %vm2929_vm1 = vmmov 0   ;;  %s2930_s28 = smov [#allocation9]  }
  0x39   :  { %v2067_v4 = vpack.c.bf16 %v78_v2, %v74_v1  ;;  %v77_v7 = vld [vmem:[#allocation3 + $0x20] sm:$0xff]  ;;  %v2075_v8 = vpack.c.bf16 %v80_v5, %v76_v3  ;;  %v75_v10 = vld [vmem:[#allocation3 + $0x10] sm:$0xff]  ;;  %v82_v12 = vld [vmem:[#allocation3 + $0x48] sm:$0xff]  ;;  %s1963_s29 = sshll.u32 %s2930_s28, 4  ;;  %s1964_s29 = int_to_ptr.vmem [resolvable:$true] %s1963_s29 }
  0x3a   :  { %v2069_v9 = vpack.c.bf16 %v77_v7, %v73_v6  ;;  %v79_v11 = vld [vmem:[#allocation3 + $0x30] sm:$0xff]  ;;  %v86_v14 = vld [vmem:[#allocation3 + $0x68] sm:$0xff]  ;;  %v84_v15 = vld [vmem:[#allocation3 + $0x58] sm:$0xff]  ;;  %s2892_s30 = scalar_lea.vmem %s1964_s29, 128  ;;  %p2897_p11 = scmp.lt.s32.totalorder %s1964_s29, %s1964_s29 }
  0x3b   :  { %2068 = vmatprep.subr.bf16.mxu0 %v2067_v4  ;;  %v2077_v13 = vpack.c.bf16 %v79_v11, %v75_v10  ;;  %v88_v16 = vld [vmem:[#allocation3 + $0x78] sm:$0xff]  ;;  %2076 = vmatprep.subr.bf16.mxu1 %v2075_v8  ;;  %v2071_v17 = vpack.c.bf16 %v86_v14, %v82_v12  ;;  %v81_v19 = vld [vmem:[#allocation3 + $0x40] sm:$0xff]  ;;  %v83_v21 = vld [vmem:[#allocation3 + $0x50] sm:$0xff]  ;;  %p2893_p10 = scmp.ne.s32.totalorder %s1964_s29, %s2892_s30  ;;  %p2898_p12 = scmp.lt.s32.totalorder %s2892_s30, %s2892_s30 }
  0x3c   :  { %2070 = vmatpush1.bf16.msra.mxu0 %v2069_v9  ;;  %v2079_v18 = vpack.c.bf16 %v88_v16, %v84_v15  ;;  %v85_v20 = vld [vmem:[#allocation3 + $0x60] sm:$0xff]  ;;  %v87_v23 = vld [vmem:[#allocation3 + $0x70] sm:$0xff]  ;;  %v395_v24 = vld [vmem:[#allocation6 + $0x8] sm:$0xff] }
  0x3d   :  { %2078 = vmatpush1.bf16.msra.mxu1 %v2077_v13  ;;  %v2073_v22 = vpack.c.bf16 %v85_v20, %v81_v19  ;;  %2072 = vmatprep.subr.bf16.mxu0 %v2071_v17  ;;  %v2081_v25 = vpack.c.bf16 %v87_v23, %v83_v21  ;;  %v399_v26 = vld [vmem:[#allocation6 + $0x28] sm:$0xff]  ;;  %v397_v27 = vld [vmem:[#allocation6 + $0x18] sm:$0xff]  ;;  %v394_v31 = vld [vmem:[#allocation6] sm:$0xff]  ;;  %p2899_p13 = por %p2898_p12, %p2897_p11 }
  0x3e   :  { %2080 = vmatprep.subr.bf16.mxu1 %v2079_v18  ;;  %v401_v28 = vld [vmem:[#allocation6 + $0x38] sm:$0xff]  ;;  %v3011_v29 = vpack.c.bf16 %v399_v26, %v395_v24  ;;  %v398_v32 = vld [vmem:[#allocation6 + $0x20] sm:$0xff]  ;;  %v396_v33 = vld [vmem:[#allocation6 + $0x10] sm:$0xff] }
  0x3f   :  { %v3013_v30 = vpack.c.bf16 %v401_v28, %v397_v27  ;;  %v65_v34 = vld [vmem:[%s3490_s0] sm:$0xff]  ;;  %v3018_v35 = vpack.c.bf16 %v398_v32, %v394_v31  ;;  %v400_v36 = vld [vmem:[#allocation6 + $0x30] sm:$0xff]  ;;  %v403_v37 = vld [vmem:[#allocation6 + $0x48] sm:$0xff]  ;;  %p2900_p0 = pnand %p2899_p13, %p2893_p10 }
  0x40   :  { %2074 = vmatpush1.bf16.msra.mxu0 %v2073_v22  ;;  %v3021_v38 = vpack.c.bf16 %v400_v36, %v396_v33  ;;  %v407_v39 = vld [vmem:[#allocation6 + $0x68] sm:$0xff]  ;;  %v405_v40 = vld [vmem:[#allocation6 + $0x58] sm:$0xff]  ;;  %v402_v43 = vld [vmem:[#allocation6 + $0x40] sm:$0xff] }
  0x41   :  { %2082 = vmatpush1.bf16.msra.mxu1 %v2081_v25  ;;  %2084 = vmatprep.subr.bf16.mxu0 %v3011_v29  ;;  %v409_v41 = vld [vmem:[#allocation6 + $0x78] sm:$0xff]  ;;  %v3024_v42 = vpack.c.bf16 %v407_v39, %v403_v37  ;;  %v406_v44 = vld [vmem:[#allocation6 + $0x60] sm:$0xff]  ;;  %v404_v45 = vld [vmem:[#allocation6 + $0x50] sm:$0xff] }
  0x42   :  { %2116 = vmatprep.subr.bf16.mxu1 %v3013_v30  ;;  %v66_v46 = vld [vmem:[%s3490_s0 + $0x8] sm:$0xff]  ;;  %v3030_v47 = vpack.c.bf16 %v409_v41, %v405_v40  ;;  %v408_v48 = vld [vmem:[#allocation6 + $0x70] sm:$0xff]  ;;  %v3034_v50 = vpack.c.bf16 %v406_v44, %v402_v43  ;;  %v413_v52 = vld [vmem:[#allocation6 + $0x98] sm:$0xff] }
  0x43   :  { %1973 = vmatmul.mubr.msk.f32.vlgmr.msra.gmra.mrb[0].mxu0 %vm111_vm0, %v65_v34  ;;  %v411_v49 = vld [vmem:[#allocation6 + $0x88] sm:$0xff]  ;;  %v417_v53 = vld [vmem:[#allocation6 + $0xb8] sm:$0xff]  ;;  %v3038_v54 = vpack.c.bf16 %v408_v48, %v404_v45  ;;  %v410_v55 = vld [vmem:[#allocation6 + $0x80] sm:$0xff] }
  0x44   :  { %1981 = vmatmul.mubr.msk.f32.vlgmr.msra.gmra.mrb[0].mxu1 %vm111_vm0, %v65_v34  ;;  %2086 = vmatpush1.bf16.msra.mxu0 %v3018_v35  ;;  %v415_v51 = vld [vmem:[#allocation6 + $0xa8] sm:$0xff]  ;;  %v414_v56 = vld [vmem:[#allocation6 + $0xa0] sm:$0xff]  ;;  %v412_v58 = vld [vmem:[#allocation6 + $0x90] sm:$0xff]  ;;  %v3046_v60 = vpack.c.bf16 %v417_v53, %v413_v52 }
  0x45   :  { %2118 = vmatpush1.bf16.msra.mxu1 %v3021_v38  ;;  %206 = vmatprep.mubr.f32.mxu0 %v2927_v0  ;;  %v3042_v57 = vpack.c.bf16 %v415_v51, %v411_v49  ;;  %v416_v59 = vld [vmem:[#allocation6 + $0xb0] sm:$0xff]  ;;  %v419_v61 = vld [vmem:[#allocation6 + $0xc8] sm:$0xff]  ;;  %v3053_v1 = vpack.c.bf16 %v414_v56, %v410_v55  ;;  %v421_v2 = vld [vmem:[#allocation6 + $0xd8] sm:$0xff] }
  0x46   :  { %319 = vmatprep.mubr.f32.mxu1 %v2927_v0  ;;  %2088 = vmatprep.subr.bf16.mxu0 %v3024_v42  ;;  %v423_v62 = vld [vmem:[#allocation6 + $0xe8] sm:$0xff]  ;;  %v67_v63 = vld [vmem:[%s3490_s0 + $0x10] sm:$0xff]  ;;  %v425_v3 = vld [vmem:[#allocation6 + $0xf8] sm:$0xff]  ;;  %v3057_v4 = vpack.c.bf16 %v416_v59, %v412_v58 }
  0x47   :  { %1974 = vmatmul.mubr.msk.f32.gmra.mrb[2].mxu0 %vm111_vm0, %v66_v46  ;;  %2120 = vmatprep.subr.bf16.mxu1 %v3030_v47  ;;  %v418_v5 = vld [vmem:[#allocation6 + $0xc0] sm:$0xff]  ;;  %v3061_v7 = vpack.c.bf16 %v423_v62, %v419_v61  ;;  %v420_v8 = vld [vmem:[#allocation6 + $0xd0] sm:$0xff]  ;;  %v3065_v10 = vpack.c.bf16 %v425_v3, %v421_v2  ;;  %v427_v11 = vld [vmem:[#allocation6 + $0x108] sm:$0xff] }
  0x48   :  { %1982 = vmatmul.mubr.msk.f32.gmra.mrb[2].mxu1 %vm111_vm0, %v66_v46  ;;  %2090 = vmatpush1.bf16.msra.mxu0 %v3034_v50  ;;  %v422_v6 = vld [vmem:[#allocation6 + $0xe0] sm:$0xff]  ;;  %v424_v9 = vld [vmem:[#allocation6 + $0xf0] sm:$0xff]  ;;  %v431_v12 = vld [vmem:[#allocation6 + $0x128] sm:$0xff] }
  0x49   :  { %2122 = vmatpush1.bf16.msra.mxu1 %v3038_v54  ;;  %212 = vmatprep.mubr.f32.mxu0 %v2927_v0  ;;  %v68_v13 = vld [vmem:[%s3490_s0 + $0x18] sm:$0xff]  ;;  %v3072_v14 = vpack.c.bf16 %v422_v6, %v418_v5  ;;  %v3076_v17 = vpack.c.bf16 %v424_v9, %v420_v8  ;;  %v426_v18 = vld [vmem:[#allocation6 + $0x100] sm:$0xff]  ;;  %v3080_v20 = vpack.c.bf16 %v431_v12, %v427_v11  ;;  %v428_v21 = vld [vmem:[#allocation6 + $0x110] sm:$0xff] }
  0x4a   :  { %325 = vmatprep.mubr.f32.mxu1 %v2927_v0  ;;  %2092 = vmatprep.subr.bf16.mxu0 %v3042_v57  ;;  %v429_v15 = vld [vmem:[#allocation6 + $0x118] sm:$0xff]  ;;  %v430_v19 = vld [vmem:[#allocation6 + $0x120] sm:$0xff]  ;;  %v432_v22 = vld [vmem:[#allocation6 + $0x130] sm:$0xff] }
  0x4b   :  { %1975 = vmatmul.mubr.msk.f32.gmra.mrb[4].mxu0 %vm111_vm0, %v67_v63  ;;  %2124 = vmatprep.subr.bf16.mxu1 %v3046_v60  ;;  %v433_v16 = vld [vmem:[#allocation6 + $0x138] sm:$0xff]  ;;  %v435_v24 = vld [vmem:[#allocation6 + $0x148] sm:$0xff]  ;;  %v69_v26 = vld [vmem:[%s3490_s0 + $0x20] sm:$0xff]  ;;  %v3091_v27 = vpack.c.bf16 %v430_v19, %v426_v18  ;;  %v3095_v32 = vpack.c.bf16 %v432_v22, %v428_v21  ;;  %v91_v19 = vlaneseq }
  0x4c   :  { %1983 = vmatmul.mubr.msk.f32.gmra.mrb[4].mxu1 %vm111_vm0, %v67_v63  ;;  %2094 = vmatpush1.bf16.msra.mxu0 %v3053_v1  ;;  %v3084_v23 = vpack.c.bf16 %v433_v16, %v429_v15  ;;  %v439_v25 = vld [vmem:[#allocation6 + $0x168] sm:$0xff]  ;;  %v437_v28 = vld [vmem:[#allocation6 + $0x158] sm:$0xff]  ;;  %v434_v33 = vld [vmem:[#allocation6 + $0x140] sm:$0xff] }
  0x4d   :  { %2126 = vmatpush1.bf16.msra.mxu1 %v3057_v4  ;;  %218 = vmatprep.mubr.f32.mxu0 %v2927_v0  ;;  %v441_v31 = vld [vmem:[#allocation6 + $0x178] sm:$0xff]  ;;  %v438_v34 = vld [vmem:[#allocation6 + $0x160] sm:$0xff]  ;;  %v3099_v36 = vpack.c.bf16 %v439_v25, %v435_v24  ;;  %v436_v37 = vld [vmem:[#allocation6 + $0x150] sm:$0xff]  ;;  %v92_v21 = vshrl.u32 %v91_v19, 7 }
  0x4e   :  { %331 = vmatprep.mubr.f32.mxu1 %v2927_v0  ;;  %2096 = vmatprep.subr.bf16.mxu0 %v3061_v7  ;;  %v440_v39 = vld [vmem:[#allocation6 + $0x170] sm:$0xff]  ;;  %v3103_v40 = vpack.c.bf16 %v441_v31, %v437_v28  ;;  %v443_v41 = vld [vmem:[#allocation6 + $0x188] sm:$0xff]  ;;  %v3110_v45 = vpack.c.bf16 %v438_v34, %v434_v33  ;;  %v445_v46 = vld [vmem:[#allocation6 + $0x198] sm:$0xff] }
  0x4f   :  { %1976 = vmatmul.mubr.msk.f32.gmra.mrb[6].mxu0 %vm111_vm0, %v68_v13  ;;  %2128 = vmatprep.subr.bf16.mxu1 %v3065_v10  ;;  %v447_v43 = vld [vmem:[#allocation6 + $0x1a8] sm:$0xff]  ;;  %v449_v48 = vld [vmem:[#allocation6 + $0x1b8] sm:$0xff]  ;;  %v3114_v49 = vpack.c.bf16 %v440_v39, %v436_v37  ;;  %v442_v51 = vld [vmem:[#allocation6 + $0x180] sm:$0xff]  ;;  %v93_v22 = vsub.s32 0, %v92_v21  ;;  %v97_v25 = vsub.s32 1, %v92_v21  ;;  %v105_v33 = vsub.s32 3, %v92_v21 }
  0x50   :  { %1984 = vmatmul.mubr.msk.f32.gmra.mrb[6].mxu1 %vm111_vm0, %v68_v13  ;;  %2098 = vmatpush1.bf16.msra.mxu0 %v3072_v14  ;;  %v70_v44 = vld [vmem:[%s3490_s0 + $0x28] sm:$0xff]  ;;  %v446_v52 = vld [vmem:[#allocation6 + $0x1a0] sm:$0xff]  ;;  %v3118_v53 = vpack.c.bf16 %v447_v43, %v443_v41  ;;  %v444_v55 = vld [vmem:[#allocation6 + $0x190] sm:$0xff]  ;;  %v3122_v58 = vpack.c.bf16 %v449_v48, %v445_v46 }
  0x51   :  { %2130 = vmatpush1.bf16.msra.mxu1 %v3076_v17  ;;  %224 = vmatprep.mubr.f32.mxu0 %v2927_v0  ;;  %v448_v56 = vld [vmem:[#allocation6 + $0x1b0] sm:$0xff]  ;;  %v451_v59 = vld [vmem:[#allocation6 + $0x1c8] sm:$0xff]  ;;  %v3129_v63 = vpack.c.bf16 %v446_v52, %v442_v51  ;;  %v453_v2 = vld [vmem:[#allocation6 + $0x1d8] sm:$0xff]  ;;  %v101_v51 = vsub.s32 2, %v92_v21 }
  0x52   :  { %337 = vmatprep.mubr.f32.mxu1 %v2927_v0  ;;  %2100 = vmatprep.subr.bf16.mxu0 %v3080_v20  ;;  %v455_v61 = vld [vmem:[#allocation6 + $0x1e8] sm:$0xff]  ;;  %v71_v62 = vld [vmem:[%s3490_s0 + $0x30] sm:$0xff]  ;;  %v457_v3 = vld [vmem:[#allocation6 + $0x1f8] sm:$0xff]  ;;  %v3133_v5 = vpack.c.bf16 %v448_v56, %v444_v55 }
  0x53   :  { %1977 = vmatmul.mubr.msk.f32.gmra.mrb[8].mxu0 %vm111_vm0, %v69_v26  ;;  %2132 = vmatprep.subr.bf16.mxu1 %v3084_v23  ;;  %v450_v6 = vld [vmem:[#allocation6 + $0x1c0] sm:$0xff]  ;;  %v3137_v9 = vpack.c.bf16 %v455_v61, %v451_v59  ;;  %v452_v11 = vld [vmem:[#allocation6 + $0x1d0] sm:$0xff]  ;;  %v3141_v13 = vpack.c.bf16 %v457_v3, %v453_v2  ;;  %v72_v15 = vld [vmem:[%s3490_s0 + $0x38] sm:$0xff] }
  0x54   :  { %1985 = vmatmul.mubr.msk.f32.gmra.mrb[8].mxu1 %vm111_vm0, %v69_v26  ;;  %2102 = vmatpush1.bf16.msra.mxu0 %v3091_v27  ;;  %v454_v8 = vld [vmem:[#allocation6 + $0x1e0] sm:$0xff]  ;;  %v456_v12 = vld [vmem:[#allocation6 + $0x1f0] sm:$0xff] }
  0x55   :  { %2134 = vmatpush1.bf16.msra.mxu1 %v3095_v32  ;;  %230 = vmatprep.mubr.f32.mxu0 %v2927_v0  ;;  %v3148_v16 = vpack.c.bf16 %v454_v8, %v450_v6  ;;  %v3152_v18 = vpack.c.bf16 %v456_v12, %v452_v11  ;;  %v89_v24 = vld [vmem:[%s3493_s3] sm:$0xf] }
  0x56   :  { %343 = vmatprep.mubr.f32.mxu1 %v2927_v0  ;;  %2104 = vmatprep.subr.bf16.mxu0 %v3099_v36  ;;  %v3204_v26 = vrot.slane %v89_v24, %v93_v22  ;;  %v3206_v28 = vrot.slane %v89_v24, %v97_v25  ;;  %v3210_v48 = vrot.slane %v89_v24, %v105_v33 }
  0x57   :  { %1978 = vmatmul.mubr.msk.f32.gmra.mrb[10].mxu0 %vm111_vm0, %v70_v44  ;;  %2136 = vmatprep.subr.bf16.mxu1 %v3103_v40  ;;  %v3213_v55 = vrot.slane %v89_v24, %v101_v51 }
  0x58   :  { %1986 = vmatmul.mubr.msk.f32.gmra.mrb[10].mxu1 %vm111_vm0, %v70_v44  ;;  %2106 = vmatpush1.bf16.msra.mxu0 %v3110_v45 }
  0x59   :  { %2138 = vmatpush1.bf16.msra.mxu1 %v3114_v49  ;;  %236 = vmatprep.mubr.f32.mxu0 %v2927_v0 }
  0x5a   :  { %349 = vmatprep.mubr.f32.mxu1 %v2927_v0  ;;  %2108 = vmatprep.subr.bf16.mxu0 %v3118_v53 }
  0x5b   :  { %1979 = vmatmul.mubr.msk.f32.gmra.mrb[12].mxu0 %vm111_vm0, %v71_v62  ;;  %2140 = vmatprep.subr.bf16.mxu1 %v3122_v58 }
  0x5c   :  { %1987 = vmatmul.mubr.msk.f32.gmra.mrb[12].mxu1 %vm111_vm0, %v71_v62  ;;  %2110 = vmatpush1.bf16.msra.mxu0 %v3129_v63 }
  0x5d   :  { %2142 = vmatpush1.bf16.msra.mxu1 %v3133_v5  ;;  %242 = vmatprep.mubr.f32.mxu0 %v2927_v0 }
  0x5e   :  { %355 = vmatprep.mubr.f32.mxu1 %v2927_v0  ;;  %2112 = vmatprep.subr.bf16.mxu0 %v3137_v9 }
  0x5f   :  { %1980 = vmatmul.mubr.msk.f32.gmra.mrb[14].mxu0 %vm111_vm0, %v72_v15  ;;  %2144 = vmatprep.subr.bf16.mxu1 %v3141_v13 }
  0x60   :  { %1988 = vmatmul.mubr.msk.f32.gmra.mrb[14].mxu1 %vm111_vm0, %v72_v15  ;;  %2114 = vmatpush1.bf16.msra.mxu0 %v3148_v16 }
  0x61   :  { %2146 = vmatpush1.bf16.msra.mxu1 %v3152_v18  ;;  %526 = vmatprep.mubr.f32.mxu0 %v2927_v0 }
  0x62   :  { %597 = vmatprep.mubr.f32.mxu1 %v2927_v0  ;;  %2148 = vmatprep.subr.bf16.mxu0 %v3011_v29 }
  0x63   :  { %527 = vmatmul.mubr.f32.vlgmr.msra.gmra.mrb[0].mxu0 %v2927_v0  ;;  %2180 = vmatprep.subr.bf16.mxu1 %v3013_v30 }
  0x64   :  { %598 = vmatmul.mubr.f32.vlgmr.msra.gmra.mrb[0].mxu1 %v2927_v0  ;;  %2150 = vmatpush1.bf16.msra.mxu0 %v3018_v35 }
  0x65   :  { %2182 = vmatpush1.bf16.msra.mxu1 %v3021_v38  ;;  %2152 = vmatprep.subr.bf16.mxu0 %v3024_v42 }
  0x66   :  { %2184 = vmatprep.subr.bf16.mxu1 %v3030_v47  ;;  %701 = vmatprep.mubr.f32.mxu0 %v2927_v0 }
  0x67   :  { %772 = vmatprep.mubr.f32.mxu1 %v2927_v0 }
  0x68   :  { %2154 = vmatpush1.bf16.msra.mxu0 %v3034_v50 }
  0x69   :  { %2186 = vmatpush1.bf16.msra.mxu1 %v3038_v54  ;;  %2156 = vmatprep.subr.bf16.mxu0 %v3042_v57 }
  0x6a   :  { %2188 = vmatprep.subr.bf16.mxu1 %v3046_v60 }
  0x6c   :  { %2158 = vmatpush1.bf16.msra.mxu0 %v3053_v1 }
  0x6d   :  { %2190 = vmatpush1.bf16.msra.mxu1 %v3057_v4  ;;  %2160 = vmatprep.subr.bf16.mxu0 %v3061_v7 }
  0x6e   :  { %2192 = vmatprep.subr.bf16.mxu1 %v3065_v10 }
  0x70   :  { %2162 = vmatpush1.bf16.msra.mxu0 %v3072_v14 }
  0x71   :  { %2194 = vmatpush1.bf16.msra.mxu1 %v3076_v17  ;;  %2164 = vmatprep.subr.bf16.mxu0 %v3080_v20 }
  0x72   :  { %2196 = vmatprep.subr.bf16.mxu1 %v3084_v23 }
  0x74   :  { %2166 = vmatpush1.bf16.msra.mxu0 %v3091_v27 }
  0x75   :  { %2198 = vmatpush1.bf16.msra.mxu1 %v3095_v32  ;;  %2168 = vmatprep.subr.bf16.mxu0 %v3099_v36 }
  0x76   :  { %2200 = vmatprep.subr.bf16.mxu1 %v3103_v40 }
  0x78   :  { %2170 = vmatpush1.bf16.msra.mxu0 %v3110_v45 }
  0x79   :  { %2202 = vmatpush1.bf16.msra.mxu1 %v3114_v49  ;;  %2172 = vmatprep.subr.bf16.mxu0 %v3118_v53 }
  0x7a   :  { %2204 = vmatprep.subr.bf16.mxu1 %v3122_v58 }
  0x7c   :  { %2174 = vmatpush1.bf16.msra.mxu0 %v3129_v63 }
  0x7d   :  { %2206 = vmatpush1.bf16.msra.mxu1 %v3133_v5  ;;  %2176 = vmatprep.subr.bf16.mxu0 %v3137_v9 }
  0x7e   :  { %2208 = vmatprep.subr.bf16.mxu1 %v3141_v13 }
  0x80   :  { %2178 = vmatpush1.bf16.msra.mxu0 %v3148_v16 }
  0x81   :  { %2210 = vmatpush1.bf16.msra.mxu1 %v3152_v18  ;;  %2212 = vmatprep.subr.bf16.mxu0 %v3011_v29 }
  0x82   :  { %2244 = vmatprep.subr.bf16.mxu1 %v3013_v30 }
 0x136   :  { %v528_v31 = vpop.f32.mrb[0].mxu0 }
 0x137   :  { %v2619_v34 = vadd.f32 %v528_v31, %v3204_v26  ;;  %v599_v37 = vpop.f32.mrb[0].mxu1  ;;  %v530_v39 = vpop.f32.mrb[1].mxu0 }
 0x138   :  { %v2620_v41 = vadd.f32 %v530_v39, %v3206_v28  ;;  %v601_v43 = vpop.f32.mrb[1].mxu1  ;;  %v2635_v59 = vadd.f32 %v599_v37, %v3213_v55 }
 0x139   :  { %v1989_v44 = vmul.f32 -1.442695, %v2619_v34  ;;  %v2636_v52 = vadd.f32 %v601_v43, %v3210_v48 }
 0x13a   :  { %v1990_v46 = vmul.f32 -1.442695, %v2620_v41 }
 0x13b   :  { %2694 = vpow2.f32 %v1989_v44  ;;  %v1991_v56 = vmul.f32 -1.442695, %v2636_v52 }
 0x13c   :  { %2696 = vpow2.f32 %v1990_v46 }
 0x13d   :  { %2698 = vpow2.f32 %v1991_v56 }
 0x13e   :  { %2700 = vtanh.f32 %v2635_v59 }
 0x145   :  { %v2695_v61 = vpop.eup %2694 }
 0x146   :  { %v2697_v62 = vpop.eup %2696  ;;  %v611_v2 = vadd.f32 1.0, %v2695_v61 }
 0x147   :  { %v617_v3 = vadd.f32 1.0, %v2697_v62  ;;  %v2699_v6 = vpop.eup %2698 }
 0x148   :  { %2702 = vrcp.f32 %v611_v2  ;;  %v2701_v8 = vpop.eup %2700  ;;  %v624_v19 = vadd.f32 1.0, %v2699_v6 }
 0x149   :  { %2704 = vrcp.f32 %v617_v3 }
 0x14a   :  { %2706 = vrcp.f32 %v624_v19 }
 0x152   :  { %v2703_v11 = vpop.eup %2702 }
 0x153   :  { %v2705_v12 = vpop.eup %2704  ;;  %v628_v15 = vmul.f32 %v2703_v11, %v2701_v8 }
 0x154   :  { %v627_v21 = vmul.f32 0.0, %v2705_v12  ;;  %v2707_v24 = vpop.eup %2706 }
 0x156   :  { %v3216_v22 = vadd.f32 %v628_v15, %v627_v21 }
 0x158   :  { %2708 = vtanh.f32 %v3216_v22 }
 0x162   :  { %v2709_v25 = vpop.eup %2708 }
 0x163   :  { %v631_v31 = vmul.f32 %v2709_v25, %v2707_v24 }
 0x165   :  { %702 = vmatmul.mubr.f32.vlgmr.msra.gmra.mrb[2].mxu0 %v631_v31  ;;  %773 = vmatmul.mubr.f32.vlgmr.msra.gmra.mrb[2].mxu1 %v631_v31 }
 0x166   :  { %2214 = vmatpush1.bf16.msra.mxu0 %v3018_v35  ;;  %2246 = vmatpush1.bf16.msra.mxu1 %v3021_v38 }
 0x167   :  { %2216 = vmatprep.subr.bf16.mxu0 %v3024_v42  ;;  %2248 = vmatprep.subr.bf16.mxu1 %v3030_v47 }
 0x168   :  { %876 = vmatprep.mubr.f32.mxu0 %v2927_v0  ;;  %947 = vmatprep.mubr.f32.mxu1 %v2927_v0 }
 0x16a   :  { %2218 = vmatpush1.bf16.msra.mxu0 %v3034_v50  ;;  %2250 = vmatpush1.bf16.msra.mxu1 %v3038_v54 }
 0x16b   :  { %2220 = vmatprep.subr.bf16.mxu0 %v3042_v57  ;;  %2252 = vmatprep.subr.bf16.mxu1 %v3046_v60 }
 0x16e   :  { %2222 = vmatpush1.bf16.msra.mxu0 %v3053_v1  ;;  %2254 = vmatpush1.bf16.msra.mxu1 %v3057_v4 }
 0x16f   :  { %2224 = vmatprep.subr.bf16.mxu0 %v3061_v7  ;;  %2256 = vmatprep.subr.bf16.mxu1 %v3065_v10 }
 0x172   :  { %2226 = vmatpush1.bf16.msra.mxu0 %v3072_v14  ;;  %2258 = vmatpush1.bf16.msra.mxu1 %v3076_v17 }
 0x173   :  { %2228 = vmatprep.subr.bf16.mxu0 %v3080_v20  ;;  %2260 = vmatprep.subr.bf16.mxu1 %v3084_v23 }
 0x176   :  { %2230 = vmatpush1.bf16.msra.mxu0 %v3091_v27  ;;  %2262 = vmatpush1.bf16.msra.mxu1 %v3095_v32 }
 0x177   :  { %2232 = vmatprep.subr.bf16.mxu0 %v3099_v36  ;;  %2264 = vmatprep.subr.bf16.mxu1 %v3103_v40 }
 0x17a   :  { %2234 = vmatpush1.bf16.msra.mxu0 %v3110_v45  ;;  %2266 = vmatpush1.bf16.msra.mxu1 %v3114_v49 }
 0x17b   :  { %2236 = vmatprep.subr.bf16.mxu0 %v3118_v53  ;;  %2268 = vmatprep.subr.bf16.mxu1 %v3122_v58 }
 0x17e   :  { %2238 = vmatpush1.bf16.msra.mxu0 %v3129_v63  ;;  %2270 = vmatpush1.bf16.msra.mxu1 %v3133_v5 }
 0x17f   :  { %2240 = vmatprep.subr.bf16.mxu0 %v3137_v9  ;;  %2272 = vmatprep.subr.bf16.mxu1 %v3141_v13 }
 0x182   :  { %2242 = vmatpush1.bf16.msra.mxu0 %v3148_v16  ;;  %2274 = vmatpush1.bf16.msra.mxu1 %v3152_v18 }
 0x183   :  { %2276 = vmatprep.subr.bf16.mxu0 %v3011_v29  ;;  %2308 = vmatprep.subr.bf16.mxu1 %v3013_v30 }
 0x238   :  { %v703_v33 = vpop.f32.mrb[2].mxu0  ;;  %v774_v34 = vpop.f32.mrb[2].mxu1 }
 0x239   :  { %v2621_v37 = vadd.f32 %v703_v33, %v3204_v26  ;;  %v705_v39 = vpop.f32.mrb[3].mxu0  ;;  %v776_v41 = vpop.f32.mrb[3].mxu1  ;;  %v2637_v56 = vadd.f32 %v774_v34, %v3213_v55 }
 0x23a   :  { %v2622_v43 = vadd.f32 %v705_v39, %v3206_v28  ;;  %v2638_v51 = vadd.f32 %v776_v41, %v3210_v48 }
 0x23b   :  { %v1992_v44 = vmul.f32 -1.442695, %v2621_v37 }
 0x23c   :  { %v1993_v46 = vmul.f32 -1.442695, %v2622_v43  ;;  %v1994_v52 = vmul.f32 -1.442695, %v2638_v51 }
 0x23d   :  { %2710 = vpow2.f32 %v1992_v44 }
 0x23e   :  { %2712 = vpow2.f32 %v1993_v46 }
 0x23f   :  { %2714 = vpow2.f32 %v1994_v52 }
 0x240   :  { %2716 = vtanh.f32 %v2637_v56 }
 0x247   :  { %v2711_v59 = vpop.eup %2710 }
 0x248   :  { %v2713_v61 = vpop.eup %2712  ;;  %v786_v62 = vadd.f32 1.0, %v2711_v59 }
 0x249   :  { %v792_v2 = vadd.f32 1.0, %v2713_v61  ;;  %v2715_v3 = vpop.eup %2714 }
 0x24a   :  { %2718 = vrcp.f32 %v786_v62  ;;  %v2717_v6 = vpop.eup %2716  ;;  %v799_v15 = vadd.f32 1.0, %v2715_v3 }
 0x24b   :  { %2720 = vrcp.f32 %v792_v2 }
 0x24c   :  { %2722 = vrcp.f32 %v799_v15 }
 0x254   :  { %v2719_v8 = vpop.eup %2718 }
 0x255   :  { %v2721_v11 = vpop.eup %2720  ;;  %v803_v12 = vmul.f32 %v2719_v8, %v2717_v6 }
 0x256   :  { %v802_v19 = vmul.f32 %v2721_v11, %v3216_v22  ;;  %v2723_v24 = vpop.eup %2722 }
 0x258   :  { %v3258_v21 = vadd.f32 %v803_v12, %v802_v19 }
 0x25a   :  { %2724 = vtanh.f32 %v3258_v21 }
 0x264   :  { %v2725_v25 = vpop.eup %2724 }
 0x265   :  { %v806_v31 = vmul.f32 %v2725_v25, %v2723_v24 }
 0x267   :  { %877 = vmatmul.mubr.f32.vlgmr.msra.gmra.mrb[4].mxu0 %v806_v31  ;;  %948 = vmatmul.mubr.f32.vlgmr.msra.gmra.mrb[4].mxu1 %v806_v31 }
 0x268   :  { %2278 = vmatpush1.bf16.msra.mxu0 %v3018_v35  ;;  %2310 = vmatpush1.bf16.msra.mxu1 %v3021_v38 }
 0x269   :  { %2280 = vmatprep.subr.bf16.mxu0 %v3024_v42  ;;  %2312 = vmatprep.subr.bf16.mxu1 %v3030_v47 }
 0x26a   :  { %1051 = vmatprep.mubr.f32.mxu0 %v2927_v0  ;;  %1122 = vmatprep.mubr.f32.mxu1 %v2927_v0 }
 0x26c   :  { %2282 = vmatpush1.bf16.msra.mxu0 %v3034_v50  ;;  %2314 = vmatpush1.bf16.msra.mxu1 %v3038_v54 }
 0x26d   :  { %2284 = vmatprep.subr.bf16.mxu0 %v3042_v57  ;;  %2316 = vmatprep.subr.bf16.mxu1 %v3046_v60 }
 0x270   :  { %2286 = vmatpush1.bf16.msra.mxu0 %v3053_v1  ;;  %2318 = vmatpush1.bf16.msra.mxu1 %v3057_v4 }
 0x271   :  { %2288 = vmatprep.subr.bf16.mxu0 %v3061_v7  ;;  %2320 = vmatprep.subr.bf16.mxu1 %v3065_v10 }
 0x274   :  { %2290 = vmatpush1.bf16.msra.mxu0 %v3072_v14  ;;  %2322 = vmatpush1.bf16.msra.mxu1 %v3076_v17 }
 0x275   :  { %2292 = vmatprep.subr.bf16.mxu0 %v3080_v20  ;;  %2324 = vmatprep.subr.bf16.mxu1 %v3084_v23 }
 0x278   :  { %2294 = vmatpush1.bf16.msra.mxu0 %v3091_v27  ;;  %2326 = vmatpush1.bf16.msra.mxu1 %v3095_v32 }
 0x279   :  { %2296 = vmatprep.subr.bf16.mxu0 %v3099_v36  ;;  %2328 = vmatprep.subr.bf16.mxu1 %v3103_v40 }
 0x27c   :  { %2298 = vmatpush1.bf16.msra.mxu0 %v3110_v45  ;;  %2330 = vmatpush1.bf16.msra.mxu1 %v3114_v49 }
 0x27d   :  { %2300 = vmatprep.subr.bf16.mxu0 %v3118_v53  ;;  %2332 = vmatprep.subr.bf16.mxu1 %v3122_v58 }
 0x280   :  { %2302 = vmatpush1.bf16.msra.mxu0 %v3129_v63  ;;  %2334 = vmatpush1.bf16.msra.mxu1 %v3133_v5 }
 0x281   :  { %2304 = vmatprep.subr.bf16.mxu0 %v3137_v9  ;;  %2336 = vmatprep.subr.bf16.mxu1 %v3141_v13 }
 0x284   :  { %2306 = vmatpush1.bf16.msra.mxu0 %v3148_v16  ;;  %2338 = vmatpush1.bf16.msra.mxu1 %v3152_v18 }
 0x285   :  { %2340 = vmatprep.subr.bf16.mxu0 %v3011_v29  ;;  %2372 = vmatprep.subr.bf16.mxu1 %v3013_v30 }
 0x33a   :  { %v878_v22 = vpop.f32.mrb[4].mxu0  ;;  %v949_v33 = vpop.f32.mrb[4].mxu1 }
 0x33b   :  { %v2623_v34 = vadd.f32 %v878_v22, %v3204_v26  ;;  %v880_v37 = vpop.f32.mrb[5].mxu0  ;;  %v951_v39 = vpop.f32.mrb[5].mxu1  ;;  %v2639_v52 = vadd.f32 %v949_v33, %v3213_v55 }
 0x33c   :  { %v2624_v41 = vadd.f32 %v880_v37, %v3206_v28  ;;  %v2640_v46 = vadd.f32 %v951_v39, %v3210_v48 }
 0x33d   :  { %v1995_v43 = vmul.f32 -1.442695, %v2623_v34 }
 0x33e   :  { %v1996_v44 = vmul.f32 -1.442695, %v2624_v41  ;;  %v1997_v51 = vmul.f32 -1.442695, %v2640_v46 }
 0x33f   :  { %2726 = vpow2.f32 %v1995_v43 }
 0x340   :  { %2728 = vpow2.f32 %v1996_v44 }
 0x341   :  { %2730 = vpow2.f32 %v1997_v51 }
 0x342   :  { %2732 = vtanh.f32 %v2639_v52 }
 0x349   :  { %v2727_v56 = vpop.eup %2726 }
 0x34a   :  { %v2729_v59 = vpop.eup %2728  ;;  %v961_v61 = vadd.f32 1.0, %v2727_v56 }
 0x34b   :  { %v967_v62 = vadd.f32 1.0, %v2729_v59  ;;  %v2731_v2 = vpop.eup %2730 }
 0x34c   :  { %2734 = vrcp.f32 %v961_v61  ;;  %v2733_v3 = vpop.eup %2732  ;;  %v974_v12 = vadd.f32 1.0, %v2731_v2 }
 0x34d   :  { %2736 = vrcp.f32 %v967_v62 }
 0x34e   :  { %2738 = vrcp.f32 %v974_v12 }
 0x356   :  { %v2735_v6 = vpop.eup %2734 }
 0x357   :  { %v2737_v8 = vpop.eup %2736  ;;  %v978_v11 = vmul.f32 %v2735_v6, %v2733_v3 }
 0x358   :  { %v977_v15 = vmul.f32 %v2737_v8, %v3258_v21  ;;  %v2739_v24 = vpop.eup %2738 }
 0x35a   :  { %v3300_v19 = vadd.f32 %v978_v11, %v977_v15 }
 0x35c   :  { %2740 = vtanh.f32 %v3300_v19 }
 0x366   :  { %v2741_v25 = vpop.eup %2740 }
 0x367   :  { %v981_v31 = vmul.f32 %v2741_v25, %v2739_v24 }
 0x369   :  { %1052 = vmatmul.mubr.f32.vlgmr.msra.gmra.mrb[6].mxu0 %v981_v31  ;;  %1123 = vmatmul.mubr.f32.vlgmr.msra.gmra.mrb[6].mxu1 %v981_v31 }
 0x36a   :  { %2342 = vmatpush1.bf16.msra.mxu0 %v3018_v35  ;;  %2374 = vmatpush1.bf16.msra.mxu1 %v3021_v38 }
 0x36b   :  { %2344 = vmatprep.subr.bf16.mxu0 %v3024_v42  ;;  %2376 = vmatprep.subr.bf16.mxu1 %v3030_v47 }
 0x36c   :  { %1226 = vmatprep.mubr.f32.mxu0 %v2927_v0  ;;  %1297 = vmatprep.mubr.f32.mxu1 %v2927_v0 }
 0x36e   :  { %2346 = vmatpush1.bf16.msra.mxu0 %v3034_v50  ;;  %2378 = vmatpush1.bf16.msra.mxu1 %v3038_v54 }
 0x36f   :  { %2348 = vmatprep.subr.bf16.mxu0 %v3042_v57  ;;  %2380 = vmatprep.subr.bf16.mxu1 %v3046_v60 }
 0x372   :  { %2350 = vmatpush1.bf16.msra.mxu0 %v3053_v1  ;;  %2382 = vmatpush1.bf16.msra.mxu1 %v3057_v4 }
 0x373   :  { %2352 = vmatprep.subr.bf16.mxu0 %v3061_v7  ;;  %2384 = vmatprep.subr.bf16.mxu1 %v3065_v10 }
 0x376   :  { %2354 = vmatpush1.bf16.msra.mxu0 %v3072_v14  ;;  %2386 = vmatpush1.bf16.msra.mxu1 %v3076_v17 }
 0x377   :  { %2356 = vmatprep.subr.bf16.mxu0 %v3080_v20  ;;  %2388 = vmatprep.subr.bf16.mxu1 %v3084_v23 }
 0x37a   :  { %2358 = vmatpush1.bf16.msra.mxu0 %v3091_v27  ;;  %2390 = vmatpush1.bf16.msra.mxu1 %v3095_v32 }
 0x37b   :  { %2360 = vmatprep.subr.bf16.mxu0 %v3099_v36  ;;  %2392 = vmatprep.subr.bf16.mxu1 %v3103_v40 }
 0x37e   :  { %2362 = vmatpush1.bf16.msra.mxu0 %v3110_v45  ;;  %2394 = vmatpush1.bf16.msra.mxu1 %v3114_v49 }
 0x37f   :  { %2364 = vmatprep.subr.bf16.mxu0 %v3118_v53  ;;  %2396 = vmatprep.subr.bf16.mxu1 %v3122_v58 }
 0x382   :  { %2366 = vmatpush1.bf16.msra.mxu0 %v3129_v63  ;;  %2398 = vmatpush1.bf16.msra.mxu1 %v3133_v5 }
 0x383   :  { %2368 = vmatprep.subr.bf16.mxu0 %v3137_v9  ;;  %2400 = vmatprep.subr.bf16.mxu1 %v3141_v13 }
 0x386   :  { %2370 = vmatpush1.bf16.msra.mxu0 %v3148_v16  ;;  %2402 = vmatpush1.bf16.msra.mxu1 %v3152_v18 }
 0x387   :  { %2404 = vmatprep.subr.bf16.mxu0 %v3011_v29  ;;  %2436 = vmatprep.subr.bf16.mxu1 %v3013_v30 }
 0x43c   :  { %v1053_v21 = vpop.f32.mrb[6].mxu0  ;;  %v1124_v22 = vpop.f32.mrb[6].mxu1 }
 0x43d   :  { %v2625_v33 = vadd.f32 %v1053_v21, %v3204_v26  ;;  %v1055_v34 = vpop.f32.mrb[7].mxu0  ;;  %v1126_v37 = vpop.f32.mrb[7].mxu1  ;;  %v2641_v51 = vadd.f32 %v1124_v22, %v3213_v55 }
 0x43e   :  { %v2626_v39 = vadd.f32 %v1055_v34, %v3206_v28  ;;  %v2642_v44 = vadd.f32 %v1126_v37, %v3210_v48 }
 0x43f   :  { %v1998_v41 = vmul.f32 -1.442695, %v2625_v33 }
 0x440   :  { %v1999_v43 = vmul.f32 -1.442695, %v2626_v39  ;;  %v2000_v46 = vmul.f32 -1.442695, %v2642_v44 }
 0x441   :  { %2742 = vpow2.f32 %v1998_v41 }
 0x442   :  { %2744 = vpow2.f32 %v1999_v43 }
 0x443   :  { %2746 = vpow2.f32 %v2000_v46 }
 0x444   :  { %2748 = vtanh.f32 %v2641_v51 }
 0x44b   :  { %v2743_v52 = vpop.eup %2742 }
 0x44c   :  { %v2745_v56 = vpop.eup %2744  ;;  %v1136_v59 = vadd.f32 1.0, %v2743_v52 }
 0x44d   :  { %v1142_v61 = vadd.f32 1.0, %v2745_v56  ;;  %v2747_v62 = vpop.eup %2746 }
 0x44e   :  { %2750 = vrcp.f32 %v1136_v59  ;;  %v2749_v2 = vpop.eup %2748  ;;  %v1149_v11 = vadd.f32 1.0, %v2747_v62 }
 0x44f   :  { %2752 = vrcp.f32 %v1142_v61 }
 0x450   :  { %2754 = vrcp.f32 %v1149_v11 }
 0x458   :  { %v2751_v3 = vpop.eup %2750 }
 0x459   :  { %v2753_v6 = vpop.eup %2752  ;;  %v1153_v8 = vmul.f32 %v2751_v3, %v2749_v2 }
 0x45a   :  { %v1152_v12 = vmul.f32 %v2753_v6, %v3300_v19  ;;  %v2755_v24 = vpop.eup %2754 }
 0x45c   :  { %v3342_v15 = vadd.f32 %v1153_v8, %v1152_v12 }
 0x45e   :  { %2756 = vtanh.f32 %v3342_v15 }
 0x468   :  { %v2757_v25 = vpop.eup %2756 }
 0x469   :  { %v1156_v31 = vmul.f32 %v2757_v25, %v2755_v24 }
 0x46b   :  { %1227 = vmatmul.mubr.f32.vlgmr.msra.gmra.mrb[8].mxu0 %v1156_v31  ;;  %1298 = vmatmul.mubr.f32.vlgmr.msra.gmra.mrb[8].mxu1 %v1156_v31 }
 0x46c   :  { %2406 = vmatpush1.bf16.msra.mxu0 %v3018_v35  ;;  %2438 = vmatpush1.bf16.msra.mxu1 %v3021_v38 }
 0x46d   :  { %2408 = vmatprep.subr.bf16.mxu0 %v3024_v42  ;;  %2440 = vmatprep.subr.bf16.mxu1 %v3030_v47 }
 0x46e   :  { %1401 = vmatprep.mubr.f32.mxu0 %v2927_v0  ;;  %1472 = vmatprep.mubr.f32.mxu1 %v2927_v0 }
 0x470   :  { %2410 = vmatpush1.bf16.msra.mxu0 %v3034_v50  ;;  %2442 = vmatpush1.bf16.msra.mxu1 %v3038_v54 }
 0x471   :  { %2412 = vmatprep.subr.bf16.mxu0 %v3042_v57  ;;  %2444 = vmatprep.subr.bf16.mxu1 %v3046_v60 }
 0x474   :  { %2414 = vmatpush1.bf16.msra.mxu0 %v3053_v1  ;;  %2446 = vmatpush1.bf16.msra.mxu1 %v3057_v4 }
 0x475   :  { %2416 = vmatprep.subr.bf16.mxu0 %v3061_v7  ;;  %2448 = vmatprep.subr.bf16.mxu1 %v3065_v10 }
 0x478   :  { %2418 = vmatpush1.bf16.msra.mxu0 %v3072_v14  ;;  %2450 = vmatpush1.bf16.msra.mxu1 %v3076_v17 }
 0x479   :  { %2420 = vmatprep.subr.bf16.mxu0 %v3080_v20  ;;  %2452 = vmatprep.subr.bf16.mxu1 %v3084_v23 }
 0x47c   :  { %2422 = vmatpush1.bf16.msra.mxu0 %v3091_v27  ;;  %2454 = vmatpush1.bf16.msra.mxu1 %v3095_v32 }
 0x47d   :  { %2424 = vmatprep.subr.bf16.mxu0 %v3099_v36  ;;  %2456 = vmatprep.subr.bf16.mxu1 %v3103_v40 }
 0x480   :  { %2426 = vmatpush1.bf16.msra.mxu0 %v3110_v45  ;;  %2458 = vmatpush1.bf16.msra.mxu1 %v3114_v49 }
 0x481   :  { %2428 = vmatprep.subr.bf16.mxu0 %v3118_v53  ;;  %2460 = vmatprep.subr.bf16.mxu1 %v3122_v58 }
 0x484   :  { %2430 = vmatpush1.bf16.msra.mxu0 %v3129_v63  ;;  %2462 = vmatpush1.bf16.msra.mxu1 %v3133_v5 }
 0x485   :  { %2432 = vmatprep.subr.bf16.mxu0 %v3137_v9  ;;  %2464 = vmatprep.subr.bf16.mxu1 %v3141_v13 }
 0x488   :  { %2434 = vmatpush1.bf16.msra.mxu0 %v3148_v16  ;;  %2466 = vmatpush1.bf16.msra.mxu1 %v3152_v18 }
 0x489   :  { %2468 = vmatprep.subr.bf16.mxu0 %v3011_v29  ;;  %2500 = vmatprep.subr.bf16.mxu1 %v3013_v30 }
 0x53e   :  { %v1228_v19 = vpop.f32.mrb[8].mxu0  ;;  %v1299_v21 = vpop.f32.mrb[8].mxu1 }
 0x53f   :  { %v2627_v22 = vadd.f32 %v1228_v19, %v3204_v26  ;;  %v1230_v33 = vpop.f32.mrb[9].mxu0  ;;  %v1301_v34 = vpop.f32.mrb[9].mxu1  ;;  %v2643_v46 = vadd.f32 %v1299_v21, %v3213_v55 }
 0x540   :  { %v2628_v37 = vadd.f32 %v1230_v33, %v3206_v28  ;;  %v2644_v43 = vadd.f32 %v1301_v34, %v3210_v48 }
 0x541   :  { %v2001_v39 = vmul.f32 -1.442695, %v2627_v22 }
 0x542   :  { %v2002_v41 = vmul.f32 -1.442695, %v2628_v37  ;;  %v2003_v44 = vmul.f32 -1.442695, %v2644_v43 }
 0x543   :  { %2758 = vpow2.f32 %v2001_v39 }
 0x544   :  { %2760 = vpow2.f32 %v2002_v41 }
 0x545   :  { %2762 = vpow2.f32 %v2003_v44 }
 0x546   :  { %2764 = vtanh.f32 %v2643_v46 }
 0x54d   :  { %v2759_v51 = vpop.eup %2758 }
 0x54e   :  { %v2761_v52 = vpop.eup %2760  ;;  %v1311_v56 = vadd.f32 1.0, %v2759_v51 }
 0x54f   :  { %v1317_v59 = vadd.f32 1.0, %v2761_v52  ;;  %v2763_v61 = vpop.eup %2762 }
 0x550   :  { %2766 = vrcp.f32 %v1311_v56  ;;  %v2765_v62 = vpop.eup %2764  ;;  %v1324_v8 = vadd.f32 1.0, %v2763_v61 }
 0x551   :  { %2768 = vrcp.f32 %v1317_v59 }
 0x552   :  { %2770 = vrcp.f32 %v1324_v8 }
 0x55a   :  { %v2767_v2 = vpop.eup %2766 }
 0x55b   :  { %v2769_v3 = vpop.eup %2768  ;;  %v1328_v6 = vmul.f32 %v2767_v2, %v2765_v62 }
 0x55c   :  { %v1327_v11 = vmul.f32 %v2769_v3, %v3342_v15  ;;  %v2771_v24 = vpop.eup %2770 }
 0x55e   :  { %v3384_v12 = vadd.f32 %v1328_v6, %v1327_v11 }
 0x560   :  { %2772 = vtanh.f32 %v3384_v12 }
 0x56a   :  { %v2773_v25 = vpop.eup %2772 }
 0x56b   :  { %v1331_v31 = vmul.f32 %v2773_v25, %v2771_v24  ;;  %v1860_v25 = vld [vmem:[#allocation8 + $0x18] sm:$0xff] }
 0x56d   :  { %1402 = vmatmul.mubr.f32.vlgmr.msra.gmra.mrb[10].mxu0 %v1331_v31  ;;  %1473 = vmatmul.mubr.f32.vlgmr.msra.gmra.mrb[10].mxu1 %v1331_v31 }
 0x56e   :  { %2470 = vmatpush1.bf16.msra.mxu0 %v3018_v35  ;;  %2502 = vmatpush1.bf16.msra.mxu1 %v3021_v38 }
 0x56f   :  { %2472 = vmatprep.subr.bf16.mxu0 %v3024_v42  ;;  %2504 = vmatprep.subr.bf16.mxu1 %v3030_v47 }
 0x570   :  { %1576 = vmatprep.mubr.f32.mxu0 %v2927_v0  ;;  %1647 = vmatprep.mubr.f32.mxu1 %v2927_v0 }
 0x572   :  { %2474 = vmatpush1.bf16.msra.mxu0 %v3034_v50  ;;  %2506 = vmatpush1.bf16.msra.mxu1 %v3038_v54 }
 0x573   :  { %2476 = vmatprep.subr.bf16.mxu0 %v3042_v57  ;;  %2508 = vmatprep.subr.bf16.mxu1 %v3046_v60 }
 0x576   :  { %2478 = vmatpush1.bf16.msra.mxu0 %v3053_v1  ;;  %2510 = vmatpush1.bf16.msra.mxu1 %v3057_v4 }
 0x577   :  { %2480 = vmatprep.subr.bf16.mxu0 %v3061_v7  ;;  %2512 = vmatprep.subr.bf16.mxu1 %v3065_v10 }
 0x57a   :  { %2482 = vmatpush1.bf16.msra.mxu0 %v3072_v14  ;;  %2514 = vmatpush1.bf16.msra.mxu1 %v3076_v17 }
 0x57b   :  { %2484 = vmatprep.subr.bf16.mxu0 %v3080_v20  ;;  %2516 = vmatprep.subr.bf16.mxu1 %v3084_v23 }
 0x57e   :  { %2486 = vmatpush1.bf16.msra.mxu0 %v3091_v27  ;;  %2518 = vmatpush1.bf16.msra.mxu1 %v3095_v32 }
 0x57f   :  { %2488 = vmatprep.subr.bf16.mxu0 %v3099_v36  ;;  %2520 = vmatprep.subr.bf16.mxu1 %v3103_v40 }
 0x582   :  { %2490 = vmatpush1.bf16.msra.mxu0 %v3110_v45  ;;  %2522 = vmatpush1.bf16.msra.mxu1 %v3114_v49 }
 0x583   :  { %2492 = vmatprep.subr.bf16.mxu0 %v3118_v53  ;;  %2524 = vmatprep.subr.bf16.mxu1 %v3122_v58 }
 0x586   :  { %2494 = vmatpush1.bf16.msra.mxu0 %v3129_v63  ;;  %2526 = vmatpush1.bf16.msra.mxu1 %v3133_v5 }
 0x587   :  { %2496 = vmatprep.subr.bf16.mxu0 %v3137_v9  ;;  %2528 = vmatprep.subr.bf16.mxu1 %v3141_v13 }
 0x58a   :  { %2498 = vmatpush1.bf16.msra.mxu0 %v3148_v16  ;;  %2530 = vmatpush1.bf16.msra.mxu1 %v3152_v18 }
 0x58b   :  { %2532 = vmatprep.subr.bf16.mxu0 %v3011_v29  ;;  %2564 = vmatprep.subr.bf16.mxu1 %v3013_v30 }
 0x640   :  { %v1403_v15 = vpop.f32.mrb[10].mxu0  ;;  %v1474_v19 = vpop.f32.mrb[10].mxu1 }
 0x641   :  { %v2629_v21 = vadd.f32 %v1403_v15, %v3204_v26  ;;  %v1405_v22 = vpop.f32.mrb[11].mxu0  ;;  %v1476_v33 = vpop.f32.mrb[11].mxu1  ;;  %v2645_v44 = vadd.f32 %v1474_v19, %v3213_v55  ;;  %v1861_v15 = vld [vmem:[#allocation8 + $0x20] sm:$0xff]  ;;  %v1862_v19 = vld [vmem:[#allocation8 + $0x28] sm:$0xff] }
 0x642   :  { %v2630_v34 = vadd.f32 %v1405_v22, %v3206_v28  ;;  %v2646_v41 = vadd.f32 %v1476_v33, %v3210_v48  ;;  %v1863_v22 = vld [vmem:[#allocation8 + $0x30] sm:$0xff]  ;;  %v1864_v33 = vld [vmem:[#allocation8 + $0x38] sm:$0xff] }
 0x643   :  { %v2004_v37 = vmul.f32 -1.442695, %v2629_v21  ;;  %v2602_v21 = vpack.c.bf16 %v1862_v19, %v1861_v15 }
 0x644   :  { %v2005_v39 = vmul.f32 -1.442695, %v2630_v34  ;;  %v2006_v43 = vmul.f32 -1.442695, %v2646_v41  ;;  %v2605_v34 = vpack.c.bf16 %v1864_v33, %v1863_v22 }
 0x645   :  { %2774 = vpow2.f32 %v2004_v37  ;;  %v1865_v37 = vld [vmem:[#allocation8 + $0x40] sm:$0xff] }
 0x646   :  { %2776 = vpow2.f32 %v2005_v39  ;;  %v1866_v39 = vld [vmem:[#allocation8 + $0x48] sm:$0xff] }
 0x647   :  { %2778 = vpow2.f32 %v2006_v43  ;;  %v2608_v41 = vpack.c.bf16 %v1866_v39, %v1865_v37  ;;  %v1867_v43 = vld [vmem:[#allocation8 + $0x50] sm:$0xff] }
 0x648   :  { %2780 = vtanh.f32 %v2645_v44  ;;  %v1868_v44 = vld [vmem:[#allocation8 + $0x58] sm:$0xff] }
 0x64f   :  { %v2775_v29 = vpop.eup %2774 }
 0x650   :  { %v2777_v46 = vpop.eup %2776  ;;  %v1486_v30 = vadd.f32 1.0, %v2775_v29  ;;  %v1869_v29 = vld [vmem:[#allocation8 + $0x60] sm:$0xff] }
 0x651   :  { %v1492_v51 = vadd.f32 1.0, %v2777_v46  ;;  %v2779_v52 = vpop.eup %2778  ;;  %v2611_v46 = vpack.c.bf16 %v1868_v44, %v1867_v43 }
 0x652   :  { %2782 = vrcp.f32 %v1486_v30  ;;  %v2781_v56 = vpop.eup %2780  ;;  %v1499_v2 = vadd.f32 1.0, %v2779_v52  ;;  %v1870_v30 = vld [vmem:[#allocation8 + $0x68] sm:$0xff]  ;;  %v1871_v52 = vld [vmem:[#allocation8 + $0x70] sm:$0xff] }
 0x653   :  { %2784 = vrcp.f32 %v1492_v51  ;;  %v2614_v51 = vpack.c.bf16 %v1870_v30, %v1869_v29 }
 0x654   :  { %2786 = vrcp.f32 %v1499_v2 }
 0x65c   :  { %v2783_v59 = vpop.eup %2782 }
 0x65d   :  { %v2785_v61 = vpop.eup %2784  ;;  %v1503_v62 = vmul.f32 %v2783_v59, %v2781_v56  ;;  %v1872_v56 = vld [vmem:[#allocation8 + $0x78] sm:$0xff] }
 0x65e   :  { %v1502_v3 = vmul.f32 %v2785_v61, %v3384_v12  ;;  %v2787_v8 = vpop.eup %2786  ;;  %v1859_v12 = vld [vmem:[#allocation8 + $0x10] sm:$0xff]  ;;  %v2617_v59 = vpack.c.bf16 %v1872_v56, %v1871_v52 }
 0x65f   :  { %v2599_v31 = vpack.c.bf16 %v1860_v25, %v1859_v12 }
 0x660   :  { %v3426_v6 = vadd.f32 %v1503_v62, %v1502_v3 }
 0x662   :  { %2788 = vtanh.f32 %v3426_v6 }
 0x66c   :  { %v2789_v11 = vpop.eup %2788 }
 0x66d   :  { %v1506_v24 = vmul.f32 %v2789_v11, %v2787_v8 }
 0x66f   :  { %1577 = vmatmul.mubr.f32.vlgmr.msra.gmra.mrb[12].mxu0 %v1506_v24  ;;  %1648 = vmatmul.mubr.f32.vlgmr.msra.gmra.mrb[12].mxu1 %v1506_v24 }
 0x670   :  { %2534 = vmatpush1.bf16.msra.mxu0 %v3018_v35  ;;  %2566 = vmatpush1.bf16.msra.mxu1 %v3021_v38 }
 0x671   :  { %2536 = vmatprep.subr.bf16.mxu0 %v3024_v42  ;;  %2568 = vmatprep.subr.bf16.mxu1 %v3030_v47 }
 0x672   :  { %1751 = vmatprep.mubr.f32.mxu0 %v2927_v0  ;;  %1822 = vmatprep.mubr.f32.mxu1 %v2927_v0 }
 0x674   :  { %2538 = vmatpush1.bf16.msra.mxu0 %v3034_v50  ;;  %2570 = vmatpush1.bf16.msra.mxu1 %v3038_v54 }
 0x675   :  { %2540 = vmatprep.subr.bf16.mxu0 %v3042_v57  ;;  %2572 = vmatprep.subr.bf16.mxu1 %v3046_v60 }
 0x678   :  { %2542 = vmatpush1.bf16.msra.mxu0 %v3053_v1  ;;  %2574 = vmatpush1.bf16.msra.mxu1 %v3057_v4 }
 0x679   :  { %2544 = vmatprep.subr.bf16.mxu0 %v3061_v7  ;;  %2576 = vmatprep.subr.bf16.mxu1 %v3065_v10 }
 0x67c   :  { %2546 = vmatpush1.bf16.msra.mxu0 %v3072_v14  ;;  %2578 = vmatpush1.bf16.msra.mxu1 %v3076_v17 }
 0x67d   :  { %2548 = vmatprep.subr.bf16.mxu0 %v3080_v20  ;;  %2580 = vmatprep.subr.bf16.mxu1 %v3084_v23 }
 0x680   :  { %2550 = vmatpush1.bf16.msra.mxu0 %v3091_v27  ;;  %2582 = vmatpush1.bf16.msra.mxu1 %v3095_v32 }
 0x681   :  { %2552 = vmatprep.subr.bf16.mxu0 %v3099_v36  ;;  %2584 = vmatprep.subr.bf16.mxu1 %v3103_v40 }
 0x684   :  { %2554 = vmatpush1.bf16.msra.mxu0 %v3110_v45  ;;  %2586 = vmatpush1.bf16.msra.mxu1 %v3114_v49 }
 0x685   :  { %2556 = vmatprep.subr.bf16.mxu0 %v3118_v53  ;;  %2588 = vmatprep.subr.bf16.mxu1 %v3122_v58 }
 0x688   :  { %2558 = vmatpush1.bf16.msra.mxu0 %v3129_v63  ;;  %2590 = vmatpush1.bf16.msra.mxu1 %v3133_v5 }
 0x689   :  { %2560 = vmatprep.subr.bf16.mxu0 %v3137_v9  ;;  %2592 = vmatprep.subr.bf16.mxu1 %v3141_v13  ;;  %v1857_v9 = vld [vmem:[#allocation8] sm:$0xff]  ;;  %v1858_v13 = vld [vmem:[#allocation8 + $0x8] sm:$0xff] }
 0x68c   :  { %2562 = vmatpush1.bf16.msra.mxu0 %v3148_v16  ;;  %2594 = vmatpush1.bf16.msra.mxu1 %v3152_v18  ;;  %v2596_v16 = vpack.c.bf16 %v1858_v13, %v1857_v9  ;;  %v2928_v18 = vmov 0.0|0.0  }
 0x68d   :  { %2595 = vmatprep.subr.bf16.mxu0 %v2928_v18 }
 0x742   :  { %v1578_v35 = vpop.f32.mrb[12].mxu0  ;;  %v1649_v38 = vpop.f32.mrb[12].mxu1 }
 0x743   :  { %v2631_v42 = vadd.f32 %v1578_v35, %v3204_v26  ;;  %v1580_v47 = vpop.f32.mrb[13].mxu0  ;;  %v1651_v50 = vpop.f32.mrb[13].mxu1  ;;  %v2647_v7 = vadd.f32 %v1649_v38, %v3213_v55 }
 0x744   :  { %v2632_v54 = vadd.f32 %v1580_v47, %v3206_v28  ;;  %v2648_v1 = vadd.f32 %v1651_v50, %v3210_v48 }
 0x745   :  { %v2007_v57 = vmul.f32 -1.442695, %v2631_v42 }
 0x746   :  { %v2008_v60 = vmul.f32 -1.442695, %v2632_v54  ;;  %v2009_v4 = vmul.f32 -1.442695, %v2648_v1 }
 0x747   :  { %2790 = vpow2.f32 %v2007_v57 }
 0x748   :  { %2792 = vpow2.f32 %v2008_v60 }
 0x749   :  { %2794 = vpow2.f32 %v2009_v4 }
 0x74a   :  { %2796 = vtanh.f32 %v2647_v7 }
 0x751   :  { %v2791_v10 = vpop.eup %2790 }
 0x752   :  { %v2793_v14 = vpop.eup %2792  ;;  %v1661_v17 = vadd.f32 1.0, %v2791_v10 }
 0x753   :  { %v1667_v20 = vadd.f32 1.0, %v2793_v14  ;;  %v2795_v23 = vpop.eup %2794 }
 0x754   :  { %2798 = vrcp.f32 %v1661_v17  ;;  %v2797_v27 = vpop.eup %2796  ;;  %v1674_v45 = vadd.f32 1.0, %v2795_v23  ;;  %v2013_v17 = vld [vmem:[%s3495_s5] ss:$0 sm:$0xff] }
 0x755   :  { %2800 = vrcp.f32 %v1667_v20 }
 0x756   :  { %2802 = vrcp.f32 %v1674_v45 }
 0x75e   :  { %v2799_v32 = vpop.eup %2798 }
 0x75f   :  { %v2801_v36 = vpop.eup %2800  ;;  %v1678_v40 = vmul.f32 %v2799_v32, %v2797_v27 }
 0x760   :  { %v1677_v49 = vmul.f32 %v2801_v36, %v3426_v6  ;;  %v2803_v58 = vpop.eup %2802 }
 0x762   :  { %v3466_v53 = vadd.f32 %v1678_v40, %v1677_v49 }
 0x764   :  { %2804 = vtanh.f32 %v3466_v53 }
 0x76e   :  { %v2805_v63 = vpop.eup %2804 }
 0x76f   :  { %v1681_v5 = vmul.f32 %v2805_v63, %v2803_v58 }
 0x771   :  { %1752 = vmatmul.mubr.f32.vlgmr.msra.gmra.mrb[14].mxu0 %v1681_v5  ;;  %1823 = vmatmul.mubr.f32.vlgmr.msra.gmra.mrb[14].mxu1 %v1681_v5 }
 0x772   :  { %2597 = vmatpush3.bf16.msra.mxu0 %v2596_v16  ;;  %2064 = vmatprep.mubr.msk.f32.mxu0 %vm2929_vm1, %v2927_v0 }
 0x773   :  { %2598 = vmatprep.subr.bf16.mxu0 %v2928_v18 }
 0x776   :  { %2600 = vmatpush3.bf16.msra.mxu0 %v2599_v31 }
 0x777   :  { %2601 = vmatprep.subr.bf16.mxu0 %v2928_v18 }
 0x77a   :  { %2603 = vmatpush3.bf16.msra.mxu0 %v2602_v21 }
 0x77b   :  { %2604 = vmatprep.subr.bf16.mxu0 %v2928_v18 }
 0x77e   :  { %2606 = vmatpush3.bf16.msra.mxu0 %v2605_v34 }
 0x77f   :  { %2607 = vmatprep.subr.bf16.mxu0 %v2928_v18 }
 0x782   :  { %2609 = vmatpush3.bf16.msra.mxu0 %v2608_v41 }
 0x783   :  { %2610 = vmatprep.subr.bf16.mxu0 %v2928_v18 }
 0x786   :  { %2612 = vmatpush3.bf16.msra.mxu0 %v2611_v46 }
 0x787   :  { %2613 = vmatprep.subr.bf16.mxu0 %v2928_v18 }
 0x78a   :  { %2615 = vmatpush3.bf16.msra.mxu0 %v2614_v51 }
 0x78b   :  { %2616 = vmatprep.subr.bf16.mxu0 %v2928_v18 }
 0x78e   :  { %2618 = vmatpush3.bf16.msra.mxu0 %v2617_v59 }
 0x844   :  { %v1753_v61 = vpop.f32.mrb[14].mxu0  ;;  %v1824_v62 = vpop.f32.mrb[14].mxu1 }
 0x845   :  { %v2633_v2 = vadd.f32 %v1753_v61, %v3204_v26  ;;  %v1755_v3 = vpop.f32.mrb[15].mxu0  ;;  %v1826_v6 = vpop.f32.mrb[15].mxu1  ;;  %v2649_v38 = vadd.f32 %v1824_v62, %v3213_v55 }
 0x846   :  { %v2634_v8 = vadd.f32 %v1755_v3, %v3206_v28  ;;  %v2650_v0 = vadd.f32 %v1826_v6, %v3210_v48 }
 0x847   :  { %v2010_v11 = vmul.f32 -1.442695, %v2633_v2 }
 0x848   :  { %v2011_v24 = vmul.f32 -1.442695, %v2634_v8  ;;  %v2012_v35 = vmul.f32 -1.442695, %v2650_v0 }
 0x849   :  { %2806 = vpow2.f32 %v2010_v11 }
 0x84a   :  { %2808 = vpow2.f32 %v2011_v24 }
 0x84b   :  { %2810 = vpow2.f32 %v2012_v35 }
 0x84c   :  { %2812 = vtanh.f32 %v2649_v38 }
 0x853   :  { %v2807_v42 = vpop.eup %2806 }
 0x854   :  { %v2809_v47 = vpop.eup %2808  ;;  %v1836_v50 = vadd.f32 1.0, %v2807_v42 }
 0x855   :  { %v1842_v54 = vadd.f32 1.0, %v2809_v47  ;;  %v2811_v26 = vpop.eup %2810 }
 0x856   :  { %2814 = vrcp.f32 %v1836_v50  ;;  %v2813_v57 = vpop.eup %2812  ;;  %v1849_v4 = vadd.f32 1.0, %v2811_v26 }
 0x857   :  { %2816 = vrcp.f32 %v1842_v54 }
 0x858   :  { %2818 = vrcp.f32 %v1849_v4 }
 0x860   :  { %v2815_v28 = vpop.eup %2814 }
 0x861   :  { %v2817_v60 = vpop.eup %2816  ;;  %v1853_v1 = vmul.f32 %v2815_v28, %v2813_v57 }
 0x862   :  { %v1852_v7 = vmul.f32 %v2817_v60, %v3466_v53  ;;  %v2819_v55 = vpop.eup %2818 }
 0x864   :  { %v1854_v48 = vadd.f32 %v1853_v1, %v1852_v7 }
 0x866   :  { %2820 = vtanh.f32 %v1854_v48 }
 0x870   :  { %v2821_v10 = vpop.eup %2820 }
 0x871   :  { %v1856_v14 = vmul.f32 %v2821_v10, %v2819_v55 }
 0x873   :  { %2065 = vmatmul.mubr.f32.vlgmr.msra.gmra.mrb[16].mxu0 %v1856_v14 }
 0x946   :  { %v1946_v20 = vpop.f32.mrb[16].mxu0 }
 0x947   :  { %v1947_v23 = vadd.f32 %v2013_v17, %v1946_v20  ;;  %v2066_v27 = vpop.f32.mrb[17].mxu0 }
 0x949   :  { %v2014_v32 = vmul.f32 -1.442695, %v1947_v23 }
 0x94b   :  { %2822 = vpow2.f32 %v2014_v32 }
 0x955   :  { %v2823_v36 = vpop.eup %2822 }
 0x956   :  { %v1953_v40 = vadd.f32 1.0, %v2823_v36 }
 0x958   :  { %2824 = vrcp.f32 %v1953_v40 }
 0x962   :  { %v2825_v45 = vpop.eup %2824 }
 0x963   :  { %1956 = vst [vmem:[#allocation9] sm:$0xff] %v2825_v45 }
 0x964   :  { %2903 = shalt.err (!%p2900_p0)
}
 0x965   :  { %s2904_s8 = scalar_lea.hbm %s3496_s6, 128 }
 0x966   :  { %p2905_p1 = scmp.ne.s32.totalorder %s3496_s6, %s2904_s8  ;;  %p2908_p2 = scmp.lt.u32.totalorder %s2904_s8, %s3496_s6 }
 0x968   :  { %p2910_p3 = pnand %p2908_p2, %p2905_p1 }
 0x96a   :  { %2913 = shalt.err (!%p2910_p3)
}
 0x96b   :  { %1966 = dma.vmem_to_hbm [thread:$0]  %s1964_s29, 128, %s3496_s6, [#allocation5]  }
 0x96c   :  { %2918 = dma.done.wait [#allocation5], 128  }
 0x96d   :  { %2919 = vsyncadd [#allocation5], 4294967168 }
 0x96e   :  { %1970 = vsyncpa [#allocation4], 1 }
 0x96f   :  { %1971 = vsyncpa [#allocation7], 1 }
 0x970   :  { %1972 = vsyncpa [#allocation5], 1 }

</bundles_post_ra>
